<compile_context>
chip_gen: v7x
topology: tpu7x:2x2x1
jax: 0.10.0
libtpu: 0.0.40
codegen_flags: <defaults>
</compile_context>

<pallas_src>
import functools

import jax
import jax.numpy as jnp
import numpy as np
from jax.experimental import pallas as pl
from jax.experimental.pallas import tpu as pltpu

EPS = 1e-5  # nn.LayerNorm default eps


def _ln_basic_block_kernel(x_ref, mask_ref, wf1_ref, g1_ref, b1_ref,
                           wf2_ref, g2_ref, b2_ref, o_ref,
                           xp_ref, patch_ref, *, H, W, pad):
    """One grid step == one batch sample, activations as (C, H*W) slabs."""
    C = x_ref.shape[1]
    HW = H * W

    # Halo-only zero fill of the shared padded line buffer, once per grid step.
    # (Both convs reuse this scratch; the interior is fully overwritten each
    #  time, the halos are never written by the convs, so per-step zeroing is
    #  safe even when the batch axis is split across cores.)
    xp_ref[:, :pad] = jnp.zeros((C, pad), jnp.float32)
    xp_ref[:, pad + HW:] = jnp.zeros((C, pad), jnp.float32)

    def conv3x3(h, wf_ref):
        # h: (C, H*W) activation slab.  Write it into the interior of the
        # padded, flattened line buffer (halos already zero -> y-out-of-bounds
        # taps read zeros automatically).
        xp_ref[:, pad:pad + HW] = h
        # im2col: 9 contiguous lane-shifted taps, edge-masked (x wraparound and
        # y halo) by a precomputed {0,1} mask, stacked on the sublane axis.
        for ky in range(3):
            for kx in range(3):
                t = ky * 3 + kx
                d = (ky - 1) * W + (kx - 1)
                tap = xp_ref[:, pad + d:pad + d + HW]                  # (C, HW)
                patch_ref[t * C:(t + 1) * C, :] = tap * mask_ref[t:t + 1, :]
        # One folded MXU matmul per conv: (C, 9C) @ (9C, HW) -> (C, HW),
        # lane-dense output, f32 accumulation.
        # TODO(synk): cast operands to bf16 (keep preferred_element_type=f32)
        # once channels are large enough for the MXU to matter on v6e/v7x; kept
        # f32 here to preserve the tight numerical check at C=4.
        return jnp.dot(wf_ref[...], patch_ref[...],
                       preferred_element_type=jnp.float32)

    def layernorm(h, g_ref, b_ref):
        # LayerNorm over normalized_shape=(C, H, W) == the whole per-sample
        # slab.  Fused single-pass statistics: var = E[h^2] - mean^2.
        inv_n = 1.0 / (C * HW)
        mu = jnp.sum(h, axis=(0, 1), keepdims=True) * inv_n
        ex2 = jnp.sum(h * h, axis=(0, 1), keepdims=True) * inv_n
        var = ex2 - mu * mu
        return (h - mu) * jax.lax.rsqrt(var + EPS) * g_ref[...] + b_ref[...]

    x = x_ref[0]                                           # (C, HW)
    h = conv3x3(x, wf1_ref)                                # conv1
    h = jnp.maximum(layernorm(h, g1_ref, b1_ref), 0.0)     # ln1 + relu
    h = conv3x3(h, wf2_ref)                                # conv2
    h = layernorm(h, g2_ref, b2_ref)                       # ln2
    o_ref[0] = jnp.maximum(h + x, 0.0)                     # identity shortcut + relu


def ln_basic_block2(x_nchw, w1_oihw, ln1_w, ln1_b, w2_oihw, ln2_w, ln2_b):
    """Wrapper: NCHW in/out with PyTorch-shaped params; kernel works on (C, H*W) slabs."""
    N, Cin, H, W = x_nchw.shape
    C = w1_oihw.shape[0]
    if Cin != C or w2_oihw.shape[:2] != (C, C):
        # Only the identity-shortcut configuration (stride=1, in_planes==planes).
        raise ValueError("ln_basic_block2 requires in_planes == planes (identity shortcut).")
    HW = H * W

    # Lane-dense slabs: pure reshapes, no layout transposes needed.
    x = x_nchw.reshape(N, C, HW).astype(jnp.float32)
    # Fold conv weights so wf[co, (ky*3+kx)*Cin + ci] == w[co, ci, ky, kx].
    wf1 = jnp.transpose(w1_oihw, (0, 2, 3, 1)).reshape(C, 9 * C).astype(jnp.float32)
    wf2 = jnp.transpose(w2_oihw, (0, 2, 3, 1)).reshape(C, 9 * C).astype(jnp.float32)
    g1 = ln1_w.reshape(C, HW).astype(jnp.float32)
    b1 = ln1_b.reshape(C, HW).astype(jnp.float32)
    g2 = ln2_w.reshape(C, HW).astype(jnp.float32)
    b2 = ln2_b.reshape(C, HW).astype(jnp.float32)

    # Precomputed per-tap validity masks (1.0 = valid output pixel for that tap).
    yy, xx = np.mgrid[0:H, 0:W]
    masks = []
    for ky in range(3):
        for kx in range(3):
            dy, dx = ky - 1, kx - 1
            valid = ((yy + dy >= 0) & (yy + dy < H) &
                     (xx + dx >= 0) & (xx + dx < W))
            masks.append(valid.reshape(HW))
    mask = jnp.asarray(np.stack(masks).astype(np.float32))        # (9, HW)

    pad = W + 1  # halo wide enough for all 9 flattened tap offsets
    kernel = functools.partial(_ln_basic_block_kernel, H=H, W=W, pad=pad)

    out = pl.pallas_call(
        kernel,
        out_shape=jax.ShapeDtypeStruct((N, C, HW), jnp.float32),
        grid=(N,),
        in_specs=[
            pl.BlockSpec((1, C, HW), lambda n: (n, 0, 0)),   # x (per-sample slab)
            pl.BlockSpec((9, HW), lambda n: (0, 0)),         # tap masks
            pl.BlockSpec((C, 9 * C), lambda n: (0, 0)),      # folded conv1 weights
            pl.BlockSpec((C, HW), lambda n: (0, 0)),         # ln1 gamma
            pl.BlockSpec((C, HW), lambda n: (0, 0)),         # ln1 beta
            pl.BlockSpec((C, 9 * C), lambda n: (0, 0)),      # folded conv2 weights
            pl.BlockSpec((C, HW), lambda n: (0, 0)),         # ln2 gamma
            pl.BlockSpec((C, HW), lambda n: (0, 0)),         # ln2 beta
        ],
        out_specs=pl.BlockSpec((1, C, HW), lambda n: (n, 0, 0)),
        scratch_shapes=[
            pltpu.VMEM((C, HW + 2 * pad), jnp.float32),      # shared padded line buffer
            pltpu.VMEM((9 * C, HW), jnp.float32),            # folded im2col patches
        ],
        compiler_params=pltpu.CompilerParams(
            dimension_semantics=("parallel",)),              # batch across TCs on v7x
    )(x, mask, wf1, g1, b1, wf2, g2, b2)
    return out.reshape(N, C, H, W)


def _reference(x, w1, g1, b1, w2, g2, b2):
    """Pure-JAX NCHW reference matching the PyTorch forward."""
    def conv(h, w):
        return jax.lax.conv_general_dilated(
            h, w, window_strides=(1, 1), padding=[(1, 1), (1, 1)],
            dimension_numbers=('NCHW', 'OIHW', 'NCHW'),
            precision=jax.lax.Precision.HIGHEST)

    def ln(h, g, b):
        mu = jnp.mean(h, axis=(1, 2, 3), keepdims=True)
        var = jnp.mean((h - mu) ** 2, axis=(1, 2, 3), keepdims=True)
        return (h - mu) / jnp.sqrt(var + EPS) * g[None] + b[None]

    out = jax.nn.relu(ln(conv(x, w1), g1, b1))
    out = ln(conv(out, w2), g2, b2)
    return jax.nn.relu(out + x)


if __name__ == "__main__":
    # Small config consistent with the module: in_planes = planes = 4, stride = 1,
    # spatial 16x16, LayerNorm normalized_shape = (planes, 16, 16).
    N, C, H, W = 2, 4, 16, 16

    key = jax.random.PRNGKey(0)
    kx, k1, k2, kg1, kb1, kg2, kb2 = jax.random.split(key, 7)

    x = jax.random.normal(kx, (N, C, H, W), dtype=jnp.float32)
    conv1_w = 0.1 * jax.random.normal(k1, (C, C, 3, 3), dtype=jnp.float32)   # (Cout,Cin,3,3)
    conv2_w = 0.1 * jax.random.normal(k2, (C, C, 3, 3), dtype=jnp.float32)
    ln1_w = 1.0 + 0.1 * jax.random.normal(kg1, (C, H, W), dtype=jnp.float32)  # LN affine
    ln1_b = 0.1 * jax.random.normal(kb1, (C, H, W), dtype=jnp.float32)
    ln2_w = 1.0 + 0.1 * jax.random.normal(kg2, (C, H, W), dtype=jnp.float32)
    ln2_b = 0.1 * jax.random.normal(kb2, (C, H, W), dtype=jnp.float32)

    out = ln_basic_block2(x, conv1_w, ln1_w, ln1_b, conv2_w, ln2_w, ln2_b)
    out = jax.block_until_ready(out)

    ref = jax.block_until_ready(
        _reference(x, conv1_w, ln1_w, ln1_b, conv2_w, ln2_w, ln2_b))

    np.testing.assert_allclose(np.asarray(out), np.asarray(ref), rtol=1e-4, atol=1e-4)
    print("KERNEL_OK")
</pallas_src>

<mosaic_0001>
module attributes {stable_mosaic.version = 11 : i64} {
  func.func @_ln_basic_block_kernel(%arg0: i32, %arg1: memref<1x4x256xf32, #tpu.memory_space<vmem>>, %arg2: memref<9x256xf32, #tpu.memory_space<vmem>>, %arg3: memref<4x36xf32, #tpu.memory_space<vmem>>, %arg4: memref<4x256xf32, #tpu.memory_space<vmem>>, %arg5: memref<4x256xf32, #tpu.memory_space<vmem>>, %arg6: memref<4x36xf32, #tpu.memory_space<vmem>>, %arg7: memref<4x256xf32, #tpu.memory_space<vmem>>, %arg8: memref<4x256xf32, #tpu.memory_space<vmem>>, %arg9: memref<1x4x256xf32, #tpu.memory_space<vmem>>, %arg10: memref<4x290xf32, #tpu.memory_space<vmem>>, %arg11: memref<36x256xf32, #tpu.memory_space<vmem>>) attributes {dimension_semantics = [#tpu.dimension_semantics<parallel>], iteration_bounds = array<i64: 2>, scalar_prefetch = 0 : i64, scratch_operands = 2 : i64, tpu.core_type = #tpu.core_type<tc>, window_params = [{transform_indices = @transform_0, window_bounds = array<i64: 1, 4, 256>}, {pipeline_mode = #tpu.pipeline_mode<synchronous>, transform_indices = @transform_1, window_bounds = array<i64: 9, 256>}, {pipeline_mode = #tpu.pipeline_mode<synchronous>, transform_indices = @transform_2, window_bounds = array<i64: 4, 36>}, {pipeline_mode = #tpu.pipeline_mode<synchronous>, transform_indices = @transform_3, window_bounds = array<i64: 4, 256>}, {pipeline_mode = #tpu.pipeline_mode<synchronous>, transform_indices = @transform_4, window_bounds = array<i64: 4, 256>}, {pipeline_mode = #tpu.pipeline_mode<synchronous>, transform_indices = @transform_5, window_bounds = array<i64: 4, 36>}, {pipeline_mode = #tpu.pipeline_mode<synchronous>, transform_indices = @transform_6, window_bounds = array<i64: 4, 256>}, {pipeline_mode = #tpu.pipeline_mode<synchronous>, transform_indices = @transform_7, window_bounds = array<i64: 4, 256>}, {transform_indices = @transform_8, window_bounds = array<i64: 1, 4, 256>}]} {
    %cst = arith.constant 0.000000e+00 : f32
    %0 = vector.broadcast %cst : f32 to vector<4x17xf32>
    %c0 = arith.constant 0 : index
    %c0_0 = arith.constant 0 : index
    %1 = vector.load %arg10[%c0, %c0_0] : memref<4x290xf32, #tpu.memory_space<vmem>>, vector<4x17xf32>
    tpu.vector_store %arg10[%c0, %c0_0], %0 {strides = array<i32>} : memref<4x290xf32, #tpu.memory_space<vmem>>, vector<4x17xf32>,
    %cst_1 = arith.constant 0.000000e+00 : f32
    %2 = vector.broadcast %cst_1 : f32 to vector<4x17xf32>
    %c0_2 = arith.constant 0 : index
    %c273 = arith.constant 273 : index
    %3 = vector.load %arg10[%c0_2, %c273] : memref<4x290xf32, #tpu.memory_space<vmem>>, vector<4x17xf32>
    tpu.vector_store %arg10[%c0_2, %c273], %2 {strides = array<i32>} : memref<4x290xf32, #tpu.memory_space<vmem>>, vector<4x17xf32>,
    %c0_3 = arith.constant 0 : index
    %c0_4 = arith.constant 0 : index
    %c0_5 = arith.constant 0 : index
    %4 = vector.load %arg1[%c0_3, %c0_4, %c0_5] : memref<1x4x256xf32, #tpu.memory_space<vmem>>, vector<1x4x256xf32>
    %5 = vector.shape_cast %4 : vector<1x4x256xf32> to vector<4x256xf32>
    %c0_6 = arith.constant 0 : index
    %c17 = arith.constant 17 : index
    %6 = vector.load %arg10[%c0_6, %c17] : memref<4x290xf32, #tpu.memory_space<vmem>>, vector<4x256xf32>
    tpu.vector_store %arg10[%c0_6, %c17], %5 {strides = array<i32>} : memref<4x290xf32, #tpu.memory_space<vmem>>, vector<4x256xf32>,
    %c0_7 = arith.constant 0 : index
    %c0_8 = arith.constant 0 : index
    %7 = vector.load %arg10[%c0_7, %c0_8] : memref<4x290xf32, #tpu.memory_space<vmem>>, vector<4x256xf32>
    %c0_9 = arith.constant 0 : index
    %c0_10 = arith.constant 0 : index
    %8 = vector.load %arg2[%c0_9, %c0_10] : memref<9x256xf32, #tpu.memory_space<vmem>>, vector<1x256xf32>
    %9 = vector.broadcast %8 : vector<1x256xf32> to vector<4x256xf32>
    %10 = arith.mulf %7, %9 : vector<4x256xf32>
    %c0_11 = arith.constant 0 : index
    %c0_12 = arith.constant 0 : index
    %11 = vector.load %arg11[%c0_11, %c0_12] : memref<36x256xf32, #tpu.memory_space<vmem>>, vector<4x256xf32>
    tpu.vector_store %arg11[%c0_11, %c0_12], %10 {strides = array<i32>} : memref<36x256xf32, #tpu.memory_space<vmem>>, vector<4x256xf32>,
    %c0_13 = arith.constant 0 : index
    %c1 = arith.constant 1 : index
    %12 = vector.load %arg10[%c0_13, %c1] : memref<4x290xf32, #tpu.memory_space<vmem>>, vector<4x256xf32>
    %c1_14 = arith.constant 1 : index
    %c0_15 = arith.constant 0 : index
    %13 = vector.load %arg2[%c1_14, %c0_15] : memref<9x256xf32, #tpu.memory_space<vmem>>, vector<1x256xf32>
    %14 = vector.broadcast %13 : vector<1x256xf32> to vector<4x256xf32>
    %15 = arith.mulf %12, %14 : vector<4x256xf32>
    %c4 = arith.constant 4 : index
    %c0_16 = arith.constant 0 : index
    %16 = vector.load %arg11[%c4, %c0_16] : memref<36x256xf32, #tpu.memory_space<vmem>>, vector<4x256xf32>
    tpu.vector_store %arg11[%c4, %c0_16], %15 {strides = array<i32>} : memref<36x256xf32, #tpu.memory_space<vmem>>, vector<4x256xf32>,
    %c0_17 = arith.constant 0 : index
    %c2 = arith.constant 2 : index
    %17 = vector.load %arg10[%c0_17, %c2] : memref<4x290xf32, #tpu.memory_space<vmem>>, vector<4x256xf32>
    %c2_18 = arith.constant 2 : index
    %c0_19 = arith.constant 0 : index
    %18 = vector.load %arg2[%c2_18, %c0_19] : memref<9x256xf32, #tpu.memory_space<vmem>>, vector<1x256xf32>
    %19 = vector.broadcast %18 : vector<1x256xf32> to vector<4x256xf32>
    %20 = arith.mulf %17, %19 : vector<4x256xf32>
    %c8 = arith.constant 8 : index
    %c0_20 = arith.constant 0 : index
    %21 = vector.load %arg11[%c8, %c0_20] : memref<36x256xf32, #tpu.memory_space<vmem>>, vector<4x256xf32>
    tpu.vector_store %arg11[%c8, %c0_20], %20 {strides = array<i32>} : memref<36x256xf32, #tpu.memory_space<vmem>>, vector<4x256xf32>,
    %c0_21 = arith.constant 0 : index
    %c16 = arith.constant 16 : index
    %22 = vector.load %arg10[%c0_21, %c16] : memref<4x290xf32, #tpu.memory_space<vmem>>, vector<4x256xf32>
    %c3 = arith.constant 3 : index
    %c0_22 = arith.constant 0 : index
    %23 = vector.load %arg2[%c3, %c0_22] : memref<9x256xf32, #tpu.memory_space<vmem>>, vector<1x256xf32>
    %24 = vector.broadcast %23 : vector<1x256xf32> to vector<4x256xf32>
    %25 = arith.mulf %22, %24 : vector<4x256xf32>
    %c12 = arith.constant 12 : index
    %c0_23 = arith.constant 0 : index
    %26 = vector.load %arg11[%c12, %c0_23] : memref<36x256xf32, #tpu.memory_space<vmem>>, vector<4x256xf32>
    tpu.vector_store %arg11[%c12, %c0_23], %25 {strides = array<i32>} : memref<36x256xf32, #tpu.memory_space<vmem>>, vector<4x256xf32>,
    %c0_24 = arith.constant 0 : index
    %c17_25 = arith.constant 17 : index
    %27 = vector.load %arg10[%c0_24, %c17_25] : memref<4x290xf32, #tpu.memory_space<vmem>>, vector<4x256xf32>
    %c4_26 = arith.constant 4 : index
    %c0_27 = arith.constant 0 : index
    %28 = vector.load %arg2[%c4_26, %c0_27] : memref<9x256xf32, #tpu.memory_space<vmem>>, vector<1x256xf32>
    %29 = vector.broadcast %28 : vector<1x256xf32> to vector<4x256xf32>
    %30 = arith.mulf %27, %29 : vector<4x256xf32>
    %c16_28 = arith.constant 16 : index
    %c0_29 = arith.constant 0 : index
    %31 = vector.load %arg11[%c16_28, %c0_29] : memref<36x256xf32, #tpu.memory_space<vmem>>, vector<4x256xf32>
    tpu.vector_store %arg11[%c16_28, %c0_29], %30 {strides = array<i32>} : memref<36x256xf32, #tpu.memory_space<vmem>>, vector<4x256xf32>,
    %c0_30 = arith.constant 0 : index
    %c18 = arith.constant 18 : index
    %32 = vector.load %arg10[%c0_30, %c18] : memref<4x290xf32, #tpu.memory_space<vmem>>, vector<4x256xf32>
    %c5 = arith.constant 5 : index
    %c0_31 = arith.constant 0 : index
    %33 = vector.load %arg2[%c5, %c0_31] : memref<9x256xf32, #tpu.memory_space<vmem>>, vector<1x256xf32>
    %34 = vector.broadcast %33 : vector<1x256xf32> to vector<4x256xf32>
    %35 = arith.mulf %32, %34 : vector<4x256xf32>
    %c20 = arith.constant 20 : index
    %c0_32 = arith.constant 0 : index
    %36 = vector.load %arg11[%c20, %c0_32] : memref<36x256xf32, #tpu.memory_space<vmem>>, vector<4x256xf32>
    tpu.vector_store %arg11[%c20, %c0_32], %35 {strides = array<i32>} : memref<36x256xf32, #tpu.memory_space<vmem>>, vector<4x256xf32>,
    %c0_33 = arith.constant 0 : index
    %c32 = arith.constant 32 : index
    %37 = vector.load %arg10[%c0_33, %c32] : memref<4x290xf32, #tpu.memory_space<vmem>>, vector<4x256xf32>
    %c6 = arith.constant 6 : index
    %c0_34 = arith.constant 0 : index
    %38 = vector.load %arg2[%c6, %c0_34] : memref<9x256xf32, #tpu.memory_space<vmem>>, vector<1x256xf32>
    %39 = vector.broadcast %38 : vector<1x256xf32> to vector<4x256xf32>
    %40 = arith.mulf %37, %39 : vector<4x256xf32>
    %c24 = arith.constant 24 : index
    %c0_35 = arith.constant 0 : index
    %41 = vector.load %arg11[%c24, %c0_35] : memref<36x256xf32, #tpu.memory_space<vmem>>, vector<4x256xf32>
    tpu.vector_store %arg11[%c24, %c0_35], %40 {strides = array<i32>} : memref<36x256xf32, #tpu.memory_space<vmem>>, vector<4x256xf32>,
    %c0_36 = arith.constant 0 : index
    %c33 = arith.constant 33 : index
    %42 = vector.load %arg10[%c0_36, %c33] : memref<4x290xf32, #tpu.memory_space<vmem>>, vector<4x256xf32>
    %c7 = arith.constant 7 : index
    %c0_37 = arith.constant 0 : index
    %43 = vector.load %arg2[%c7, %c0_37] : memref<9x256xf32, #tpu.memory_space<vmem>>, vector<1x256xf32>
    %44 = vector.broadcast %43 : vector<1x256xf32> to vector<4x256xf32>
    %45 = arith.mulf %42, %44 : vector<4x256xf32>
    %c28 = arith.constant 28 : index
    %c0_38 = arith.constant 0 : index
    %46 = vector.load %arg11[%c28, %c0_38] : memref<36x256xf32, #tpu.memory_space<vmem>>, vector<4x256xf32>
    tpu.vector_store %arg11[%c28, %c0_38], %45 {strides = array<i32>} : memref<36x256xf32, #tpu.memory_space<vmem>>, vector<4x256xf32>,
    %c0_39 = arith.constant 0 : index
    %c34 = arith.constant 34 : index
    %47 = vector.load %arg10[%c0_39, %c34] : memref<4x290xf32, #tpu.memory_space<vmem>>, vector<4x256xf32>
    %c8_40 = arith.constant 8 : index
    %c0_41 = arith.constant 0 : index
    %48 = vector.load %arg2[%c8_40, %c0_41] : memref<9x256xf32, #tpu.memory_space<vmem>>, vector<1x256xf32>
    %49 = vector.broadcast %48 : vector<1x256xf32> to vector<4x256xf32>
    %50 = arith.mulf %47, %49 : vector<4x256xf32>
    %c32_42 = arith.constant 32 : index
    %c0_43 = arith.constant 0 : index
    %51 = vector.load %arg11[%c32_42, %c0_43] : memref<36x256xf32, #tpu.memory_space<vmem>>, vector<4x256xf32>
    tpu.vector_store %arg11[%c32_42, %c0_43], %50 {strides = array<i32>} : memref<36x256xf32, #tpu.memory_space<vmem>>, vector<4x256xf32>,
    %c0_44 = arith.constant 0 : index
    %c0_45 = arith.constant 0 : index
    %52 = vector.load %arg3[%c0_44, %c0_45] : memref<4x36xf32, #tpu.memory_space<vmem>>, vector<4x36xf32>
    %c0_46 = arith.constant 0 : index
    %c0_47 = arith.constant 0 : index
    %53 = vector.load %arg11[%c0_46, %c0_47] : memref<36x256xf32, #tpu.memory_space<vmem>>, vector<36x256xf32>
    %cst_48 = arith.constant dense<0.000000e+00> : vector<4x256xf32>
    %54 = tpu.matmul %52, %53, %cst_48 {dimension_numbers = #tpu.dot_dimension_numbers<[1], [0], [0], [1], [0, 0, 1, 1], [], []>} : vector<4x36xf32>, vector<36x256xf32>, vector<4x256xf32> -> vector<4x256xf32>
    %55 = vector.shape_cast %54 : vector<4x256xf32> to vector<1x4x256xf32>
    %cst_49 = arith.constant dense<0.000000e+00> : vector<1xf32>
    %56 = vector.multi_reduction <add>, %55, %cst_49 [1, 2] : vector<1x4x256xf32> to vector<1xf32>
    %57 = vector.shape_cast %56 : vector<1xf32> to vector<1x1x1xf32>
    %58 = vector.extract %57[0, 0, 0] : f32 from vector<1x1x1xf32>
    %59 = vector.broadcast %58 : f32 to vector<1x1xf32>
    %cst_50 = arith.constant 9.765625E-4 : f32
    %60 = vector.broadcast %cst_50 : f32 to vector<1x1xf32>
    %61 = arith.mulf %59, %60 : vector<1x1xf32>
    %62 = arith.mulf %54, %54 : vector<4x256xf32>
    %63 = vector.shape_cast %62 : vector<4x256xf32> to vector<1x4x256xf32>
    %cst_51 = arith.constant dense<0.000000e+00> : vector<1xf32>
    %64 = vector.multi_reduction <add>, %63, %cst_51 [1, 2] : vector<1x4x256xf32> to vector<1xf32>
    %65 = vector.shape_cast %64 : vector<1xf32> to vector<1x1x1xf32>
    %66 = vector.extract %65[0, 0, 0] : f32 from vector<1x1x1xf32>
    %67 = vector.broadcast %66 : f32 to vector<1x1xf32>
    %cst_52 = arith.constant 9.765625E-4 : f32
    %68 = vector.broadcast %cst_52 : f32 to vector<1x1xf32>
    %69 = arith.mulf %67, %68 : vector<1x1xf32>
    %70 = arith.mulf %61, %61 : vector<1x1xf32>
    %71 = arith.subf %69, %70 : vector<1x1xf32>
    %72 = vector.broadcast %61 : vector<1x1xf32> to vector<4x256xf32>
    %73 = arith.subf %54, %72 : vector<4x256xf32>
    %cst_53 = arith.constant 9.99999974E-6 : f32
    %74 = vector.broadcast %cst_53 : f32 to vector<1x1xf32>
    %75 = arith.addf %71, %74 : vector<1x1xf32>
    %76 = math.rsqrt %75 : vector<1x1xf32>
    %77 = vector.broadcast %76 : vector<1x1xf32> to vector<4x256xf32>
    %78 = arith.mulf %73, %77 : vector<4x256xf32>
    %c0_54 = arith.constant 0 : index
    %c0_55 = arith.constant 0 : index
    %79 = vector.load %arg4[%c0_54, %c0_55] : memref<4x256xf32, #tpu.memory_space<vmem>>, vector<4x256xf32>
    %80 = arith.mulf %78, %79 : vector<4x256xf32>
    %c0_56 = arith.constant 0 : index
    %c0_57 = arith.constant 0 : index
    %81 = vector.load %arg5[%c0_56, %c0_57] : memref<4x256xf32, #tpu.memory_space<vmem>>, vector<4x256xf32>
    %82 = arith.addf %80, %81 : vector<4x256xf32>
    %cst_58 = arith.constant 0.000000e+00 : f32
    %83 = vector.broadcast %cst_58 : f32 to vector<4x256xf32>
    %84 = arith.maximumf %82, %83 : vector<4x256xf32>
    %c0_59 = arith.constant 0 : index
    %c17_60 = arith.constant 17 : index
    %85 = vector.load %arg10[%c0_59, %c17_60] : memref<4x290xf32, #tpu.memory_space<vmem>>, vector<4x256xf32>
    tpu.vector_store %arg10[%c0_59, %c17_60], %84 {strides = array<i32>} : memref<4x290xf32, #tpu.memory_space<vmem>>, vector<4x256xf32>,
    %c0_61 = arith.constant 0 : index
    %c0_62 = arith.constant 0 : index
    %86 = vector.load %arg10[%c0_61, %c0_62] : memref<4x290xf32, #tpu.memory_space<vmem>>, vector<4x256xf32>
    %c0_63 = arith.constant 0 : index
    %c0_64 = arith.constant 0 : index
    %87 = vector.load %arg2[%c0_63, %c0_64] : memref<9x256xf32, #tpu.memory_space<vmem>>, vector<1x256xf32>
    %88 = vector.broadcast %87 : vector<1x256xf32> to vector<4x256xf32>
    %89 = arith.mulf %86, %88 : vector<4x256xf32>
    %c0_65 = arith.constant 0 : index
    %c0_66 = arith.constant 0 : index
    %90 = vector.load %arg11[%c0_65, %c0_66] : memref<36x256xf32, #tpu.memory_space<vmem>>, vector<4x256xf32>
    tpu.vector_store %arg11[%c0_65, %c0_66], %89 {strides = array<i32>} : memref<36x256xf32, #tpu.memory_space<vmem>>, vector<4x256xf32>,
    %c0_67 = arith.constant 0 : index
    %c1_68 = arith.constant 1 : index
    %91 = vector.load %arg10[%c0_67, %c1_68] : memref<4x290xf32, #tpu.memory_space<vmem>>, vector<4x256xf32>
    %c1_69 = arith.constant 1 : index
    %c0_70 = arith.constant 0 : index
    %92 = vector.load %arg2[%c1_69, %c0_70] : memref<9x256xf32, #tpu.memory_space<vmem>>, vector<1x256xf32>
    %93 = vector.broadcast %92 : vector<1x256xf32> to vector<4x256xf32>
    %94 = arith.mulf %91, %93 : vector<4x256xf32>
    %c4_71 = arith.constant 4 : index
    %c0_72 = arith.constant 0 : index
    %95 = vector.load %arg11[%c4_71, %c0_72] : memref<36x256xf32, #tpu.memory_space<vmem>>, vector<4x256xf32>
    tpu.vector_store %arg11[%c4_71, %c0_72], %94 {strides = array<i32>} : memref<36x256xf32, #tpu.memory_space<vmem>>, vector<4x256xf32>,
    %c0_73 = arith.constant 0 : index
    %c2_74 = arith.constant 2 : index
    %96 = vector.load %arg10[%c0_73, %c2_74] : memref<4x290xf32, #tpu.memory_space<vmem>>, vector<4x256xf32>
    %c2_75 = arith.constant 2 : index
    %c0_76 = arith.constant 0 : index
    %97 = vector.load %arg2[%c2_75, %c0_76] : memref<9x256xf32, #tpu.memory_space<vmem>>, vector<1x256xf32>
    %98 = vector.broadcast %97 : vector<1x256xf32> to vector<4x256xf32>
    %99 = arith.mulf %96, %98 : vector<4x256xf32>
    %c8_77 = arith.constant 8 : index
    %c0_78 = arith.constant 0 : index
    %100 = vector.load %arg11[%c8_77, %c0_78] : memref<36x256xf32, #tpu.memory_space<vmem>>, vector<4x256xf32>
    tpu.vector_store %arg11[%c8_77, %c0_78], %99 {strides = array<i32>} : memref<36x256xf32, #tpu.memory_space<vmem>>, vector<4x256xf32>,
    %c0_79 = arith.constant 0 : index
    %c16_80 = arith.constant 16 : index
    %101 = vector.load %arg10[%c0_79, %c16_80] : memref<4x290xf32, #tpu.memory_space<vmem>>, vector<4x256xf32>
    %c3_81 = arith.constant 3 : index
    %c0_82 = arith.constant 0 : index
    %102 = vector.load %arg2[%c3_81, %c0_82] : memref<9x256xf32, #tpu.memory_space<vmem>>, vector<1x256xf32>
    %103 = vector.broadcast %102 : vector<1x256xf32> to vector<4x256xf32>
    %104 = arith.mulf %101, %103 : vector<4x256xf32>
    %c12_83 = arith.constant 12 : index
    %c0_84 = arith.constant 0 : index
    %105 = vector.load %arg11[%c12_83, %c0_84] : memref<36x256xf32, #tpu.memory_space<vmem>>, vector<4x256xf32>
    tpu.vector_store %arg11[%c12_83, %c0_84], %104 {strides = array<i32>} : memref<36x256xf32, #tpu.memory_space<vmem>>, vector<4x256xf32>,
    %c0_85 = arith.constant 0 : index
    %c17_86 = arith.constant 17 : index
    %106 = vector.load %arg10[%c0_85, %c17_86] : memref<4x290xf32, #tpu.memory_space<vmem>>, vector<4x256xf32>
    %c4_87 = arith.constant 4 : index
    %c0_88 = arith.constant 0 : index
    %107 = vector.load %arg2[%c4_87, %c0_88] : memref<9x256xf32, #tpu.memory_space<vmem>>, vector<1x256xf32>
    %108 = vector.broadcast %107 : vector<1x256xf32> to vector<4x256xf32>
    %109 = arith.mulf %106, %108 : vector<4x256xf32>
    %c16_89 = arith.constant 16 : index
    %c0_90 = arith.constant 0 : index
    %110 = vector.load %arg11[%c16_89, %c0_90] : memref<36x256xf32, #tpu.memory_space<vmem>>, vector<4x256xf32>
    tpu.vector_store %arg11[%c16_89, %c0_90], %109 {strides = array<i32>} : memref<36x256xf32, #tpu.memory_space<vmem>>, vector<4x256xf32>,
    %c0_91 = arith.constant 0 : index
    %c18_92 = arith.constant 18 : index
    %111 = vector.load %arg10[%c0_91, %c18_92] : memref<4x290xf32, #tpu.memory_space<vmem>>, vector<4x256xf32>
    %c5_93 = arith.constant 5 : index
    %c0_94 = arith.constant 0 : index
    %112 = vector.load %arg2[%c5_93, %c0_94] : memref<9x256xf32, #tpu.memory_space<vmem>>, vector<1x256xf32>
    %113 = vector.broadcast %112 : vector<1x256xf32> to vector<4x256xf32>
    %114 = arith.mulf %111, %113 : vector<4x256xf32>
    %c20_95 = arith.constant 20 : index
    %c0_96 = arith.constant 0 : index
    %115 = vector.load %arg11[%c20_95, %c0_96] : memref<36x256xf32, #tpu.memory_space<vmem>>, vector<4x256xf32>
    tpu.vector_store %arg11[%c20_95, %c0_96], %114 {strides = array<i32>} : memref<36x256xf32, #tpu.memory_space<vmem>>, vector<4x256xf32>,
    %c0_97 = arith.constant 0 : index
    %c32_98 = arith.constant 32 : index
    %116 = vector.load %arg10[%c0_97, %c32_98] : memref<4x290xf32, #tpu.memory_space<vmem>>, vector<4x256xf32>
    %c6_99 = arith.constant 6 : index
    %c0_100 = arith.constant 0 : index
    %117 = vector.load %arg2[%c6_99, %c0_100] : memref<9x256xf32, #tpu.memory_space<vmem>>, vector<1x256xf32>
    %118 = vector.broadcast %117 : vector<1x256xf32> to vector<4x256xf32>
    %119 = arith.mulf %116, %118 : vector<4x256xf32>
    %c24_101 = arith.constant 24 : index
    %c0_102 = arith.constant 0 : index
    %120 = vector.load %arg11[%c24_101, %c0_102] : memref<36x256xf32, #tpu.memory_space<vmem>>, vector<4x256xf32>
    tpu.vector_store %arg11[%c24_101, %c0_102], %119 {strides = array<i32>} : memref<36x256xf32, #tpu.memory_space<vmem>>, vector<4x256xf32>,
    %c0_103 = arith.constant 0 : index
    %c33_104 = arith.constant 33 : index
    %121 = vector.load %arg10[%c0_103, %c33_104] : memref<4x290xf32, #tpu.memory_space<vmem>>, vector<4x256xf32>
    %c7_105 = arith.constant 7 : index
    %c0_106 = arith.constant 0 : index
    %122 = vector.load %arg2[%c7_105, %c0_106] : memref<9x256xf32, #tpu.memory_space<vmem>>, vector<1x256xf32>
    %123 = vector.broadcast %122 : vector<1x256xf32> to vector<4x256xf32>
    %124 = arith.mulf %121, %123 : vector<4x256xf32>
    %c28_107 = arith.constant 28 : index
    %c0_108 = arith.constant 0 : index
    %125 = vector.load %arg11[%c28_107, %c0_108] : memref<36x256xf32, #tpu.memory_space<vmem>>, vector<4x256xf32>
    tpu.vector_store %arg11[%c28_107, %c0_108], %124 {strides = array<i32>} : memref<36x256xf32, #tpu.memory_space<vmem>>, vector<4x256xf32>,
    %c0_109 = arith.constant 0 : index
    %c34_110 = arith.constant 34 : index
    %126 = vector.load %arg10[%c0_109, %c34_110] : memref<4x290xf32, #tpu.memory_space<vmem>>, vector<4x256xf32>
    %c8_111 = arith.constant 8 : index
    %c0_112 = arith.constant 0 : index
    %127 = vector.load %arg2[%c8_111, %c0_112] : memref<9x256xf32, #tpu.memory_space<vmem>>, vector<1x256xf32>
    %128 = vector.broadcast %127 : vector<1x256xf32> to vector<4x256xf32>
    %129 = arith.mulf %126, %128 : vector<4x256xf32>
    %c32_113 = arith.constant 32 : index
    %c0_114 = arith.constant 0 : index
    %130 = vector.load %arg11[%c32_113, %c0_114] : memref<36x256xf32, #tpu.memory_space<vmem>>, vector<4x256xf32>
    tpu.vector_store %arg11[%c32_113, %c0_114], %129 {strides = array<i32>} : memref<36x256xf32, #tpu.memory_space<vmem>>, vector<4x256xf32>,
    %c0_115 = arith.constant 0 : index
    %c0_116 = arith.constant 0 : index
    %131 = vector.load %arg6[%c0_115, %c0_116] : memref<4x36xf32, #tpu.memory_space<vmem>>, vector<4x36xf32>
    %c0_117 = arith.constant 0 : index
    %c0_118 = arith.constant 0 : index
    %132 = vector.load %arg11[%c0_117, %c0_118] : memref<36x256xf32, #tpu.memory_space<vmem>>, vector<36x256xf32>
    %cst_119 = arith.constant dense<0.000000e+00> : vector<4x256xf32>
    %133 = tpu.matmul %131, %132, %cst_119 {dimension_numbers = #tpu.dot_dimension_numbers<[1], [0], [0], [1], [0, 0, 1, 1], [], []>} : vector<4x36xf32>, vector<36x256xf32>, vector<4x256xf32> -> vector<4x256xf32>
    %134 = vector.shape_cast %133 : vector<4x256xf32> to vector<1x4x256xf32>
    %cst_120 = arith.constant dense<0.000000e+00> : vector<1xf32>
    %135 = vector.multi_reduction <add>, %134, %cst_120 [1, 2] : vector<1x4x256xf32> to vector<1xf32>
    %136 = vector.shape_cast %135 : vector<1xf32> to vector<1x1x1xf32>
    %137 = vector.extract %136[0, 0, 0] : f32 from vector<1x1x1xf32>
    %138 = vector.broadcast %137 : f32 to vector<1x1xf32>
    %cst_121 = arith.constant 9.765625E-4 : f32
    %139 = vector.broadcast %cst_121 : f32 to vector<1x1xf32>
    %140 = arith.mulf %138, %139 : vector<1x1xf32>
    %141 = arith.mulf %133, %133 : vector<4x256xf32>
    %142 = vector.shape_cast %141 : vector<4x256xf32> to vector<1x4x256xf32>
    %cst_122 = arith.constant dense<0.000000e+00> : vector<1xf32>
    %143 = vector.multi_reduction <add>, %142, %cst_122 [1, 2] : vector<1x4x256xf32> to vector<1xf32>
    %144 = vector.shape_cast %143 : vector<1xf32> to vector<1x1x1xf32>
    %145 = vector.extract %144[0, 0, 0] : f32 from vector<1x1x1xf32>
    %146 = vector.broadcast %145 : f32 to vector<1x1xf32>
    %cst_123 = arith.constant 9.765625E-4 : f32
    %147 = vector.broadcast %cst_123 : f32 to vector<1x1xf32>
    %148 = arith.mulf %146, %147 : vector<1x1xf32>
    %149 = arith.mulf %140, %140 : vector<1x1xf32>
    %150 = arith.subf %148, %149 : vector<1x1xf32>
    %151 = vector.broadcast %140 : vector<1x1xf32> to vector<4x256xf32>
    %152 = arith.subf %133, %151 : vector<4x256xf32>
    %cst_124 = arith.constant 9.99999974E-6 : f32
    %153 = vector.broadcast %cst_124 : f32 to vector<1x1xf32>
    %154 = arith.addf %150, %153 : vector<1x1xf32>
    %155 = math.rsqrt %154 : vector<1x1xf32>
    %156 = vector.broadcast %155 : vector<1x1xf32> to vector<4x256xf32>
    %157 = arith.mulf %152, %156 : vector<4x256xf32>
    %c0_125 = arith.constant 0 : index
    %c0_126 = arith.constant 0 : index
    %158 = vector.load %arg7[%c0_125, %c0_126] : memref<4x256xf32, #tpu.memory_space<vmem>>, vector<4x256xf32>
    %159 = arith.mulf %157, %158 : vector<4x256xf32>
    %c0_127 = arith.constant 0 : index
    %c0_128 = arith.constant 0 : index
    %160 = vector.load %arg8[%c0_127, %c0_128] : memref<4x256xf32, #tpu.memory_space<vmem>>, vector<4x256xf32>
    %161 = arith.addf %159, %160 : vector<4x256xf32>
    %162 = arith.addf %161, %5 : vector<4x256xf32>
    %cst_129 = arith.constant 0.000000e+00 : f32
    %163 = vector.broadcast %cst_129 : f32 to vector<4x256xf32>
    %164 = arith.maximumf %162, %163 : vector<4x256xf32>
    %c0_130 = arith.constant 0 : index
    %c0_131 = arith.constant 0 : index
    %c0_132 = arith.constant 0 : index
    %165 = vector.load %arg9[%c0_130, %c0_131, %c0_132] : memref<1x4x256xf32, #tpu.memory_space<vmem>>, vector<1x4x256xf32>
    %166 = vector.shape_cast %165 : vector<1x4x256xf32> to vector<4x256xf32>
    %167 = vector.shape_cast %164 : vector<4x256xf32> to vector<1x4x256xf32>
    tpu.vector_store %arg9[%c0_130, %c0_131, %c0_132], %167 {strides = array<i32>} : memref<1x4x256xf32, #tpu.memory_space<vmem>>, vector<1x4x256xf32>,
    return
  }
  func.func @transform_0(%arg0: i32) -> (i32, i32, i32) {
    %c0_i32 = arith.constant 0 : i32
    %c0_i32_0 = arith.constant 0 : i32
    %c0_i32_1 = arith.constant 0 : i32
    return %arg0, %c0_i32, %c0_i32_0 : i32, i32, i32
  }
  func.func @transform_1(%arg0: i32) -> (i32, i32) {
    %c0_i32 = arith.constant 0 : i32
    %c0_i32_0 = arith.constant 0 : i32
    %c0_i32_1 = arith.constant 0 : i32
    return %c0_i32, %c0_i32_0 : i32, i32
  }
  func.func @transform_2(%arg0: i32) -> (i32, i32) {
    %c0_i32 = arith.constant 0 : i32
    %c0_i32_0 = arith.constant 0 : i32
    %c0_i32_1 = arith.constant 0 : i32
    return %c0_i32, %c0_i32_0 : i32, i32
  }
  func.func @transform_3(%arg0: i32) -> (i32, i32) {
    %c0_i32 = arith.constant 0 : i32
    %c0_i32_0 = arith.constant 0 : i32
    %c0_i32_1 = arith.constant 0 : i32
    return %c0_i32, %c0_i32_0 : i32, i32
  }
  func.func @transform_4(%arg0: i32) -> (i32, i32) {
    %c0_i32 = arith.constant 0 : i32
    %c0_i32_0 = arith.constant 0 : i32
    %c0_i32_1 = arith.constant 0 : i32
    return %c0_i32, %c0_i32_0 : i32, i32
  }
  func.func @transform_5(%arg0: i32) -> (i32, i32) {
    %c0_i32 = arith.constant 0 : i32
    %c0_i32_0 = arith.constant 0 : i32
    %c0_i32_1 = arith.constant 0 : i32
    return %c0_i32, %c0_i32_0 : i32, i32
  }
  func.func @transform_6(%arg0: i32) -> (i32, i32) {
    %c0_i32 = arith.constant 0 : i32
    %c0_i32_0 = arith.constant 0 : i32
    %c0_i32_1 = arith.constant 0 : i32
    return %c0_i32, %c0_i32_0 : i32, i32
  }
  func.func @transform_7(%arg0: i32) -> (i32, i32) {
    %c0_i32 = arith.constant 0 : i32
    %c0_i32_0 = arith.constant 0 : i32
    %c0_i32_1 = arith.constant 0 : i32
    return %c0_i32, %c0_i32_0 : i32, i32
  }
  func.func @transform_8(%arg0: i32) -> (i32, i32, i32) {
    %c0_i32 = arith.constant 0 : i32
    %c0_i32_0 = arith.constant 0 : i32
    %c0_i32_1 = arith.constant 0 : i32
    return %arg0, %c0_i32, %c0_i32_0 : i32, i32, i32
  }
}

</mosaic_0001>

<bundles_post_ra>
// kernel: tpu_custom_call.1
= control target key start
LH: loop header
LB: loop body
LE: loop exit
PB: predicated region body
PF: predicated region fallthrough
CT: control target
= control target key end

     0   :  { %s2443_s0 = inlined_call_operand.hbm [shape: f32[2,4,256], index: 0, kind: input, shape index: {}]   ;;  %s2444_s1 = inlined_call_operand.hbm [shape: f32[9,256], index: 1, kind: input, shape index: {}]   ;;  %s2445_s2 = inlined_call_operand.hbm [shape: f32[4,36], index: 2, kind: input, shape index: {}]   ;;  %s2446_s3 = inlined_call_operand.vmem [shape: f32[4,256], index: 3, kind: input, shape index: {}]   ;;  %s2447_s4 = inlined_call_operand.hbm [shape: f32[4,256], index: 4, kind: input, shape index: {}]   ;;  %s2448_s5 = inlined_call_operand.hbm [shape: f32[4,36], index: 5, kind: input, shape index: {}]   ;;  %s2449_s6 = inlined_call_operand.vmem [shape: f32[4,256], index: 6, kind: input, shape index: {}]   ;;  %s2450_s7 = inlined_call_operand.vmem [shape: f32[4,256], index: 7, kind: input, shape index: {}]   ;;  %s2451_s8 = inlined_call_operand.hbm [shape: f32[2,4,256], index: 8, kind: output, shape index: {}]  }
   0x1   :  { %2465 = sst [smem:[#allocation18_spill]] %s2444_s1 }
   0x2   :  { %13 = vsyncpa [#allocation5], 0 }
   0x3   :  { %15 = vsyncpa [#allocation5 + $0x1], 0 }
   0x4   :  { %16 = vsyncpa [#allocation8], 0 }
   0x5   :  { %17 = vsyncpa [#allocation11], 0 }
   0x6   :  { %18 = vsyncpa [#allocation6], 0 }
   0x7   :  { %20 = vsyncpa [#allocation6 + $0x1], 0  ;;  %s1926_s27 = smov 0   ;;  %s1928_s28 = smov 0  }
   0x8   :  { %s1930_s29 = smov 0   ;;  %s1932_s30 = smov 0  }
   0x9 LB: > { %s1856_s9 = smov [#allocation7]   ;;  %s1947_s11 = sadd.s32 4294967295, %s1854_s30   ;;  %s1854_s30 = sphi %s1932_s30, %s2501_s30   ;;  %s1850_s29 = sphi %s1930_s29, %s2500_s29   ;;  %s1846_s28 = sphi %s1928_s28, %s2499_s28   ;;  %s1842_s27 = sphi %s1926_s27, %s2498_s27  }
   0xa   : > { %s242_s10 = sshll.u32 %s1856_s9, 4  ;;  %p1469_p0 = scmp.ge.s32.totalorder %s1854_s30, 1  ;;  %s1952_s10 = int_to_ptr.vmem [resolvable:$true] %s242_s10 }
   0xb   : > { %p2452_p1 = scmp.eq.s32.totalorder %s1947_s11, 0  ;;  %p230_p2 = scmp.lt.s32.totalorder %s1854_s30, 3 }
   0xc   : > { %s1857_s13 = smov [#allocation10]   ;;  %s1858_s16 = smov [#allocation9]  }
   0xd   : > { %p1954_p3 = pnand %p1469_p0, %p230_p2  ;;  %s270_s14 = sshll.u32 %s1857_s13, 4  ;;  %s1967_s14 = int_to_ptr.vmem [resolvable:$true] %s270_s14 }
   0xe   : > { %s256_s17 = sshll.u32 %s1858_s16, 4  ;;  %s2468_s1 = sld [smem:[#allocation18_spill]]  ;;  %s1969_s17 = int_to_ptr.vmem [resolvable:$true] %s256_s17 }
   0xf   : > { %s2466_s12 = scalar_select %p1954_p3, 1, 0 }
  0x10   : > { %p1542_p5 = pneg %p1954_p3 }
  0x12   : > { %p1963_p6 = pnand %p1542_p5, %p2452_p1 }
  0x14   : > { %s1638_s20 = scalar_lea.hbm %s2468_s1, 512  ;;  %p1979_p8 = pneg %p1963_p6 }
  0x15   : > { %p1639_p7 = scmp.ne.s32.totalorder %s2468_s1, %s1638_s20  ;;  %p1645_p11 = scmp.lt.u32.totalorder %s1638_s20, %s2468_s1 }
  0x17   : > { %p1641_p9 = pnand %p1979_p8, %p1639_p7 }
  0x19   : > { %p1642_p10 = pneg %p1641_p9 }
  0x1b   : > { %p1647_p12 = pnand %p1645_p11, %p1642_p10 }
  0x1d   : > { %1650 = shalt.err (!%p1647_p12)
}
  0x1e   : > { %s1651_s26 = scalar_lea.vmem %s1952_s10, 512  ;;  %p1659_p5 = scmp.lt.s32.totalorder %s1952_s10, %s1952_s10 }
  0x1f   : > { %p1652_p13 = scmp.ne.s32.totalorder %s1952_s10, %s1651_s26  ;;  %p1660_p4 = scmp.lt.s32.totalorder %s1651_s26, %s1651_s26 }
  0x21   : > { %p1654_p0 = pnand %p1652_p13, %p1979_p8  ;;  %p1661_p7 = por %p1660_p4, %p1659_p5 }
  0x23   : > { %p1655_p2 = pneg %p1654_p0 }
  0x25   : > { %p1662_p9 = pnand %p1661_p7, %p1655_p2 }
  0x27   : > { %1665 = shalt.err (!%p1662_p9)
}
  0x28   : > { %s1859_s9 = smov 256   ;;  %s1860_s13 = smov 16  }
  0x29   : > { %1545 = dma.hbm_to_vmem [thread:$0]  (!%p1963_p6), %s2468_s1, 512, %s1952_s10, [#allocation8], %s1859_s9, %s1859_s9, %s1860_s13  }
  0x2a   : > { %s1666_s21 = scalar_lea.hbm %s2447_s4, 128 }
  0x2b   : > { %p1667_p4 = scmp.ne.s32.totalorder %s2447_s4, %s1666_s21  ;;  %p1673_p12 = scmp.lt.u32.totalorder %s1666_s21, %s2447_s4 }
  0x2d   : > { %p1669_p10 = pnand %p1667_p4, %p1979_p8 }
  0x2f   : > { %p1670_p11 = pneg %p1669_p10 }
  0x31   : > { %p1675_p13 = pnand %p1673_p12, %p1670_p11 }
  0x33   : > { %1678 = shalt.err (!%p1675_p13)
}
  0x34   : > { %s1679_s10 = scalar_lea.vmem %s1967_s14, 128  ;;  %p1687_p7 = scmp.lt.s32.totalorder %s1967_s14, %s1967_s14 }
  0x35   : > { %p1680_p0 = scmp.ne.s32.totalorder %s1967_s14, %s1679_s10  ;;  %p1688_p9 = scmp.lt.s32.totalorder %s1679_s10, %s1679_s10 }
  0x37   : > { %p1682_p2 = pnand %p1680_p0, %p1979_p8  ;;  %p1689_p4 = por %p1688_p9, %p1687_p7 }
  0x39   : > { %p1683_p5 = pneg %p1682_p2 }
  0x3b   : > { %p1690_p10 = pnand %p1689_p4, %p1683_p5 }
  0x3d   : > { %1693 = shalt.err (!%p1690_p10)
}
  0x3e   : > { %1551 = dma.hbm_to_vmem [thread:$0]  (!%p1963_p6), %s2447_s4, 128, %s1967_s14, [#allocation11]  }
  0x3f   : > { %s1694_s19 = scalar_lea.hbm %s2445_s2, 64 }
  0x40   : > { %p1695_p11 = scmp.ne.s32.totalorder %s2445_s2, %s1694_s19  ;;  %p1701_p0 = scmp.lt.u32.totalorder %s1694_s19, %s2445_s2 }
  0x42   : > { %p1697_p12 = pnand %p1695_p11, %p1979_p8 }
  0x44   : > { %p1698_p13 = pneg %p1697_p12 }
  0x46   : > { %p1703_p2 = pnand %p1701_p0, %p1698_p13 }
  0x48   : > { %1706 = shalt.err (!%p1703_p2)
}
  0x49   : > { %s1707_s14 = scalar_lea.vmem %s1969_s17, 64  ;;  %p1715_p4 = scmp.lt.s32.totalorder %s1969_s17, %s1969_s17 }
  0x4a   : > { %p1708_p5 = scmp.ne.s32.totalorder %s1969_s17, %s1707_s14  ;;  %p1716_p10 = scmp.lt.s32.totalorder %s1707_s14, %s1707_s14 }
  0x4c   : > { %p1710_p7 = pnand %p1708_p5, %p1979_p8  ;;  %p1717_p11 = por %p1716_p10, %p1715_p4 }
  0x4e   : > { %p1711_p9 = pneg %p1710_p7 }
  0x50   : > { %p1718_p12 = pnand %p1717_p11, %p1711_p9 }
  0x52   : > { %1721 = shalt.err (!%p1718_p12)
}
  0x53   : > { %1548 = dma.hbm_to_vmem [thread:$0]  (!%p1963_p6), %s2445_s2, 64, %s1969_s17, [#allocation8]  }
  0x54   : > { %s1861_s10 = smov [#allocation12]   ;;  %s1722_s18 = scalar_lea.hbm %s2448_s5, 64 }
  0x55   : > { %s281_s9 = sshll.u32 %s1861_s10, 4  ;;  %p1723_p13 = scmp.ne.s32.totalorder %s2448_s5, %s1722_s18  ;;  %s282_s9 = int_to_ptr.vmem [resolvable:$true] %s281_s9 }
  0x56   : > { %p1729_p5 = scmp.lt.u32.totalorder %s1722_s18, %s2448_s5 }
  0x57   : > { %p1725_p0 = pnand %p1723_p13, %p1979_p8 }
  0x59   : > { %p1726_p2 = pneg %p1725_p0 }
  0x5b   : > { %p1731_p7 = pnand %p1729_p5, %p1726_p2 }
  0x5d   : > { %1734 = shalt.err (!%p1731_p7)
}
  0x5e   : > { %s1735_s17 = scalar_lea.vmem %s282_s9, 64  ;;  %p1743_p11 = scmp.lt.s32.totalorder %s282_s9, %s282_s9 }
  0x5f   : > { %p1736_p9 = scmp.ne.s32.totalorder %s282_s9, %s1735_s17  ;;  %p1744_p12 = scmp.lt.s32.totalorder %s1735_s17, %s1735_s17 }
  0x61   : > { %p1738_p4 = pnand %p1736_p9, %p1979_p8  ;;  %p1745_p1 = por %p1744_p12, %p1743_p11 }
  0x63   : > { %p1739_p10 = pneg %p1738_p4 }
  0x65   : > { %p1746_p3 = pnand %p1745_p1, %p1739_p10 }
  0x67   : > { %1749 = shalt.err (!%p1746_p3)
}
  0x68   : > { %1554 = dma.hbm_to_vmem [thread:$0]  (!%p1963_p6), %s2448_s5, 64, %s282_s9, [#allocation11]  }
  0x69   : > { %s1468_s23 = sadd.s32 4294967294, %s1854_s30   ;;  %s2066_s15 = sadd.s32 1, %s1854_s30  }
  0x6a   : > { %s30_s25 = ssub.s32 %s1854_s30, %s2066_s15  ;;  %s33_s26 = sadd.s32 1, %s1850_s29 }
  0x6b   : > { %p31_p1 = scmp.eq.s32.totalorder %s30_s25, 0  ;;  %p40_p3 = scmp.ne.s32.totalorder %s1850_s29, %s1846_s28 }
  0x6c   : > { %p41_p8 = scmp.eq.s32.totalorder %s1854_s30, 0  ;;  %p46_p13 = scmp.ne.s32.totalorder %s1846_s28, %s1842_s27 }
  0x6d   : > { %s2077_s10 = scalar_select %p31_p1, %s1850_s29, %s33_s26  }
  0x6e   : > { %p2079_p0 = por %p41_p8, %p40_p3  ;;  %p2471_p2 = scmp.eq.s32.totalorder %s1947_s11, 0 }
  0x6f   : > { %p217_p5 = scmp.eq.s32.totalorder %s1947_s11, 1  ;;  %p223_p7 = scmp.eq.s32.totalorder %s1468_s23, 1 }
  0x70   : > { %p2085_p6 = por %p2471_p2, %p46_p13  ;;  %p1567_p9 = scmp.lt.s32.totalorder %s1854_s30, 2 }
  0x71   : > { %s298_s16 = sand.u32 1, %s1850_s29   ;;  %p2092_p4 = por %p217_p5, %p40_p3 }
  0x72   : > { %p2096_p10 = por %p223_p7, %p46_p13  ;;  %s1475_s20 = sshll.u32 %s298_s16, 3 }
  0x73   : > { %s2473_s18 = scalar_select %p2092_p4, 1, 0 }
  0x74   : > { %s2474_s19 = scalar_select %p2096_p10, 1, 0 }
  0x75   : > { %s1496_s21 = sshll.u32 %s1854_s30, 7  ;;  %s302_s14 = scalar_lea.vmem [#allocation4], %s1475_s20 }
  0x76   : > { %s2104_s24 = scalar_lea.hbm %s2443_s0, %s1496_s21  ;;  %s310_s23 = sshll.u32 %s302_s14, 4  ;;  %s2106_s23 = int_to_ptr.vmem [resolvable:$true] %s310_s23 }
  0x77   : > { %p2110_p11 = pnand %p1567_p9, %p2079_p0  ;;  %s299_s26 = scalar_lea.sflag [#allocation5], %s298_s16 }
  0x78   : > { %s1750_s1 = scalar_lea.hbm %s2104_s24, 128  ;;  %s1755_s22 = scalar_lea.hbm %s2443_s0, 256 }
  0x79   : > { %p1751_p12 = scmp.ne.s32.totalorder %s2104_s24, %s1750_s1  ;;  %p1752_p1 = pneg %p2110_p11 }
  0x7a   : > { %p1756_p13 = scmp.lt.u32.totalorder %s2104_s24, %s2443_s0  ;;  %p1757_p0 = scmp.lt.u32.totalorder %s1755_s22, %s1750_s1 }
  0x7b   : > { %p1753_p3 = pnand %p1752_p1, %p1751_p12  ;;  %p1759_p5 = scmp.lt.u32.totalorder %s1750_s1, %s2104_s24 }
  0x7c   : > { %p1758_p2 = por %p1757_p0, %p1756_p13 }
  0x7d   : > { %p1754_p8 = pneg %p1753_p3 }
  0x7e   : > { %p1760_p7 = por %p1759_p5, %p1758_p2 }
  0x80   : > { %p1761_p9 = pnand %p1760_p7, %p1754_p8 }
  0x82   : > { %1764 = shalt.err (!%p1761_p9)
}
  0x83   : > { %s1765_s16 = scalar_lea.vmem %s2106_s23, 128  ;;  %s1862_s14 = smov [#allocation4]  }
  0x84   : > { %p1766_p12 = scmp.ne.s32.totalorder %s2106_s23, %s1765_s16  ;;  %s1770_s20 = sshll.u32 %s1862_s14, 4  ;;  %s1771_s20 = int_to_ptr.vmem [resolvable:$false] %s1770_s20 }
  0x85   : > { %s1772_s21 = scalar_lea.vmem %s1771_s20, 256  ;;  %p1773_p4 = scmp.lt.s32.totalorder %s2106_s23, %s1771_s20 }
  0x86   : > { %p1768_p3 = pnand %p1766_p12, %p1752_p1  ;;  %p1774_p13 = scmp.lt.s32.totalorder %s1772_s21, %s1765_s16 }
  0x88   : > { %p1769_p10 = pneg %p1768_p3  ;;  %p1775_p0 = por %p1774_p13, %p1773_p4 }
  0x8a   : > { %p1776_p2 = pnand %p1775_p0, %p1769_p10 }
  0x8c   : > { %1779 = shalt.err (!%p1776_p2)
}
  0x8d   : > { %1558 = dma.hbm_to_vmem [thread:$0]  (!%p2110_p11), %s2104_s24, 128, %s2106_s23, %s299_s26  }
  0x8e   : > { %p2476_p8 = scmp.ne.s32.totalorder %s2466_s12, 0 }
  0x8f   : > { %s2142_s1 = sand.u32 (!%p2476_p8), 1, %s1846_s28  }
  0x90   : > { %319 = sbr.rel (%p2476_p8) target bundleno = 1676 (0x68c), region = 52  ;;  %s2455_s22 = sshll.u32 (!%p2476_p8), %s2142_s1, 3 }
  0x91   : > { %s322_s13 = scalar_lea.sflag (!%p2476_p8), [#allocation5], %s2142_s1  ;;  %s2148_s17 = scalar_lea.vmem (!%p2476_p8), [#allocation4], %s2455_s22 }
  0x97   : > { %1825 = dma.done.wait (%p2085_p6), %s322_s13, 128  }
  0x98   : > { %1827 = vsyncadd (%p2085_p6), %s322_s13, 4294967168  ;;  %p2477_p4 = scmp.eq.s32.totalorder %s1947_s11, 0 }
  0x9a   : > { %1829 = dma.done.wait (%p2477_p4), [#allocation8], 576   ;;  %p2478_p10 = pmov %p2477_p4 }
  0x9b   : > { %p2479_p11 = pmov %p2477_p4 }
  0x9c   : > { %1831 = vsyncadd (%p2478_p10), [#allocation8], 4294966720 }
  0x9d   : > { %1833 = dma.done.wait (%p2479_p11), [#allocation11], 192   ;;  %p2480_p1 = pmov %p2477_p4 }
  0x9e   : > { %v395_v0 = vlaneseq  ;;  %vm374_vm0 = vcmask 134144   ;;  %vm376_vm1 = vcmask 273544   ;;  %v1863_v1 = vmov 0.0   ;;  %v378_v5 = vld [vmem:[%s2148_s17] sm:$0xff]  ;;  %s1864_s12 = smov 17   ;;  %s1865_s9 = smov 1  }
  0x9f   : > { %1835 = vsyncadd (%p2480_p1), [#allocation11], 4294967104  ;;  %375 = vst.msk [vmem:[#allocation2] sm:$0xf] %vm374_vm0, %v1863_v1  ;;  %812 = vmatprep.mubr.f32.mxu0 %v1863_v1  ;;  %1277 = vmatprep.mubr.f32.mxu1 %v1863_v1  ;;  %s1866_s24 = smov 2   ;;  %s2458_s23 = smov 16  }
  0xa0   : > { %v396_v2 = vshrl.u32 %v395_v0, 7  ;;  %377 = vst.msk [vmem:[#allocation2 + $0x8] sm:$0xf] %vm376_vm1, %v1863_v1  ;;  %v414_v6 = vld [vmem:[#allocation7 + $0x1] ss:$8 sm:$0x3]  ;;  %380 = vrot.lane.b32.xlu0 %v378_v5, %s1864_s12 }
  0xa1   : > { %v454_v9 = vld [vmem:[#allocation7 + $0x2] ss:$8 sm:$0x3]  ;;  %v493_v10 = vld [vmem:[#allocation7 + $0x3] ss:$8 sm:$0x3] }
  0xa2   : > { %v2163_v3 = vsub.s32 0, %v396_v2  ;;  %v2165_v4 = vsub.s32 1, %v396_v2  ;;  %v533_v15 = vld [vmem:[#allocation7 + $0x4] ss:$8 sm:$0x3]  ;;  %s2457_s25 = smov 32  }
  0xa3   : > { %v611_v16 = vld [vmem:[#allocation7 + $0x6] ss:$8 sm:$0x3]  ;;  %v571_v20 = vld [vmem:[#allocation7 + $0x5] ss:$8 sm:$0x3] }
  0xa4   : > { %v419_v7 = vrot.slane %v414_v6, %v2163_v3  ;;  %v423_v8 = vrot.slane %v414_v6, %v2165_v4  ;;  %v459_v11 = vrot.slane %v454_v9, %v2163_v3  ;;  %v463_v12 = vrot.slane %v454_v9, %v2165_v4  ;;  %v650_v28 = vld [vmem:[#allocation7 + $0x7] ss:$8 sm:$0x3]  ;;  %v690_v29 = vld [vmem:[#allocation7 + $0x10] ss:$8 sm:$0x3] }
  0xa5   : > { %v498_v13 = vrot.slane %v493_v10, %v2163_v3  ;;  %v502_v14 = vrot.slane %v493_v10, %v2165_v4  ;;  %v538_v18 = vrot.slane %v533_v15, %v2163_v3  ;;  %v542_v19 = vrot.slane %v533_v15, %v2165_v4  ;;  %s1869_s26 = smov 18   ;;  %s2456_s16 = smov 33   ;;  %v393_v41 = vld [vmem:[#allocation7] ss:$8 sm:$0x3] }
  0xa6   : > { %v424_v17 = vcombine.low %v419_v7, %v423_v8  ;;  %v464_v21 = vcombine.low %v459_v11, %v463_v12  ;;  %v616_v23 = vrot.slane %v611_v16, %v2163_v3  ;;  %v620_v24 = vrot.slane %v611_v16, %v2165_v4  ;;  %s1871_s14 = smov 34   ;;  %s2459_s20 = smov 126  }
  0xa7   : > { %v503_v22 = vcombine.low %v498_v13, %v502_v14  ;;  %v543_v25 = vcombine.low %v538_v18, %v542_v19  ;;  %v576_v26 = vrot.slane %v571_v20, %v2163_v3  ;;  %v580_v27 = vrot.slane %v571_v20, %v2165_v4  ;;  %s1873_s21 = smov 111   ;;  %s1874_s13 = smov 96  }
  0xa8   : > { %425 = vrot.lane.b32.xlu1 %v424_v17, %s1865_s9  ;;  %465 = vrot.lane.b32.xlu0 %v464_v21, %s1866_s24  ;;  %v621_v30 = vcombine.low %v616_v23, %v620_v24  ;;  %v655_v31 = vrot.slane %v650_v28, %v2163_v3  ;;  %v659_v32 = vrot.slane %v650_v28, %v2165_v4  ;;  %vm387_vm2 = vcmask 1043592   ;;  %s1875_s22 = smov 110   ;;  %p2495_p5 = scmp.ne.s32.totalorder %s2473_s18, 0 }
  0xa9   : > { %v581_v33 = vcombine.low %v576_v26, %v580_v27  ;;  %v695_v34 = vrot.slane %v690_v29, %v2163_v3  ;;  %v699_v35 = vrot.slane %v690_v29, %v2165_v4  ;;  %vm388_vm3 = vcmask 1047556  }
  0xaa   : > { %v660_v36 = vcombine.low %v655_v31, %v659_v32  ;;  %vm383_vm4 = vcmask 138240   ;;  %vm2193_vm5 = vmor %vm388_vm3, %vm387_vm2  ;;  %v398_v45 = vrot.slane %v393_v41, %v2163_v3  ;;  %v402_v46 = vrot.slane %v393_v41, %v2165_v4 }
  0xab   : > { %v700_v37 = vcombine.low %v695_v34, %v699_v35  ;;  %vm468_vm6 = vcmask 15360   ;;  %vm585_vm7 = vcmask 146432   ;;  %vm664_vm8 = vcmask 269312  }
  0xac   : > { %504 = vrot.lane.b32.xlu1 %v503_v22, %s2458_s23  ;;  %544 = vrot.lane.b32.xlu0 %v543_v25, %s1864_s12  ;;  %v403_v50 = vcombine.low %v398_v45, %v402_v46  ;;  %vm428_vm9 = vcmask 7168   ;;  %vm507_vm10 = vcmask 130048   ;;  %vm625_vm11 = vcmask 261120   ;;  %s1878_s23 = smov 112  }
  0xad   : > { %vm2461_vm12 = vcmask 277504   ;;  %vm601_vm13 = vcmask 900096   ;;  %vm680_vm14 = vcmask 777216   ;;  %vm444_vm15 = vcmask 1039360  }
  0xae   : > { %vm483_vm1 = vcmask 1031168   ;;  %vm2464_vm2 = vcmask 916480   ;;  %vm2462_vm3 = vcmask 908288  }
  0xb0   : > { %622 = vrot.lane.b32.xlu1 %v621_v30, %s2457_s25  ;;  %582 = vrot.lane.b32.xlu0 %v581_v33, %s1869_s26  ;;  %s1877_s25 = smov 95  }
  0xb4   : > { %661 = vrot.lane.b32.xlu1 %v660_v36, %s2456_s16  ;;  %701 = vrot.lane.b32.xlu0 %v700_v37, %s1871_s14  ;;  %s1876_s16 = smov 127  }
 0x112   : > { %v381_v38 = vpop.permute.xlu0 %380 }
 0x113   : > { %v382_v40 = vrot.slane %v381_v38, 4 }
 0x115   : > { %v384_v42 = vsel %vm383_vm4, %v382_v40, %v381_v38  ;;  %391 = vst.msk [vmem:[#allocation2 + $0x8] sm:$0xf] %vm374_vm0, %v382_v40 }
 0x116   : > { %390 = vst.msk [vmem:[#allocation2] sm:$0xff] %vm2193_vm5, %v384_v42 }
 0x11a   : > { %v2201_v43 = vpop.permute.xlu1 %425  ;;  %v466_v44 = vpop.permute.xlu0 %465 }
 0x11b   : > { %v467_v48 = vrot.slane %v466_v44, 4  ;;  %v427_v6 = vrot.slane %v2201_v43, 4 }
 0x11c   : > { %v452_v51 = vld [vmem:[#allocation2 + $0x8] sm:$0xf] }
 0x11d   : > { %v2207_v52 = vld [vmem:[#allocation2] sm:$0xff]  ;;  %v473_v53 = vmul.f32 %v467_v48, %v452_v51  ;;  %v531_v54 = vld [vmem:[#allocation2 + $0x8] sm:$0xf]  ;;  %v469_v60 = vsel %vm468_vm6, %v467_v48, %v466_v44  ;;  %v429_v12 = vsel %vm428_vm9, %v427_v6, %v2201_v43 }
 0x11e   : > { %v2205_v47 = vpop.permute.xlu1 %504  ;;  %v545_v49 = vpop.permute.xlu0 %544  ;;  %v405_v59 = vmul.f32 %v403_v50, %v2207_v52  ;;  %v472_v63 = vmul.f32 %v469_v60, %v2207_v52  ;;  %v609_v0 = vld [vmem:[#allocation2 + $0x8] sm:$0xf]  ;;  %v432_v13 = vmul.f32 %v429_v12, %v2207_v52 }
 0x11f   : > { %v546_v55 = vrot.slane %v545_v49, 4  ;;  %481 = vrot.lane.b32.xlu0 %v473_v53, %s2459_s20  ;;  %v506_v9 = vrot.slane %v2205_v47, 4  ;;  %v569_v17 = vld [vmem:[#allocation2 + $0x8] sm:$0xf] }
 0x120   : > { %409 = vst [vmem:[#allocation3] sm:$0xf] %v405_v59  ;;  %v407_v8 = vcombine.high %v405_v59, %v405_v59  ;;  %v412_v21 = vld [vmem:[#allocation2 + $0x8] sm:$0xf]  ;;  %v476_v33 = vcombine.high %v472_v63, %v472_v63  ;;  %v436_v36 = vcombine.low %v432_v13, %v432_v13 }
 0x121   : > { %v551_v61 = vmul.f32 %v546_v55, %v531_v54  ;;  %v508_v14 = vsel %vm507_vm10, %v506_v9, %v2205_v47  ;;  %v547_v16 = vsel %vm383_vm4, %v546_v55, %v545_v49  ;;  %v648_v23 = vld [vmem:[#allocation2 + $0x8] sm:$0xf]  ;;  %v433_v26 = vmul.f32 %v427_v6, %v412_v21 }
 0x122   : > { %v623_v56 = vpop.permute.xlu1 %622  ;;  %v583_v58 = vpop.permute.xlu0 %582  ;;  %410 = vst [vmem:[#allocation3 + $0x8] sm:$0xf] %v407_v8  ;;  %v511_v18 = vmul.f32 %v508_v14, %v2207_v52  ;;  %v550_v20 = vmul.f32 %v547_v16, %v2207_v52  ;;  %v491_v28 = vld [vmem:[#allocation2 + $0x8] sm:$0xf] }
 0x123   : > { %v624_v57 = vrot.slane %v623_v56, 4  ;;  %v584_v62 = vrot.slane %v583_v58, 4  ;;  %559 = vrot.lane.b32.xlu1 %v551_v61, %s1873_s21  ;;  %477 = vrot.lane.b32.xlu0 %v472_v63, %s2459_s20  ;;  %v512_v30 = vmul.f32 %v506_v9, %v491_v28  ;;  %v437_v31 = vcombine.low %v433_v26, %v433_v26  ;;  %v688_v46 = vld [vmem:[#allocation2 + $0x8] sm:$0xf] }
 0x124   : > { %v554_v37 = vcombine.high %v550_v20, %v550_v20  ;;  %v515_v40 = vcombine.low %v511_v18, %v511_v18 }
 0x125   : > { %v630_v1 = vmul.f32 %v624_v57, %v609_v0  ;;  %v586_v2 = vsel %vm585_vm7, %v584_v62, %v583_v58  ;;  %v590_v19 = vmul.f32 %v584_v62, %v569_v17  ;;  %v626_v22 = vsel %vm625_vm11, %v624_v57, %v623_v56 }
 0x126   : > { %v662_v5 = vpop.permute.xlu1 %661  ;;  %v589_v10 = vmul.f32 %v586_v2, %v2207_v52  ;;  %v629_v27 = vmul.f32 %v626_v22, %v2207_v52  ;;  %v702_v32 = vpop.permute.xlu0 %701  ;;  %v516_v34 = vcombine.low %v512_v30, %v512_v30 }
 0x127   : > { %v663_v7 = vrot.slane %v662_v5, 4  ;;  %638 = vrot.lane.b32.xlu1 %v630_v1, %s1874_s13  ;;  %v594_v25 = vcombine.low %v590_v19, %v590_v19  ;;  %v703_v35 = vrot.slane %v702_v32, 4 }
 0x128   : > { %597 = vrot.lane.b32.xlu0 %v589_v10, %s1875_s22  ;;  %v633_v42 = vcombine.high %v629_v27, %v629_v27  ;;  %v593_v43 = vcombine.low %v589_v10, %v589_v10 }
 0x129   : > { %v665_v11 = vsel %vm664_vm8, %v663_v7, %v662_v5  ;;  %v669_v24 = vmul.f32 %v663_v7, %v648_v23  ;;  %v705_v38 = vsel %vm2461_vm12, %v703_v35, %v702_v32  ;;  %v709_v47 = vmul.f32 %v703_v35, %v688_v46 }
 0x12a   : > { %v668_v15 = vmul.f32 %v665_v11, %v2207_v52  ;;  %v708_v41 = vmul.f32 %v705_v38, %v2207_v52  ;;  %vm2463_vm12 = vcmask 785408  }
 0x12b   : > { %440 = vrot.lane.b32.xlu1 %v432_v13, %s1876_s16  ;;  %v673_v29 = vcombine.low %v669_v24, %v669_v24 }
 0x12c   : > { %676 = vrot.lane.b32.xlu0 %v668_v15, %s1877_s25  ;;  %v712_v44 = vcombine.high %v708_v41, %v708_v41  ;;  %v672_v45 = vcombine.low %v668_v15, %v668_v15 }
 0x12f   : > { %519 = vrot.lane.b32.xlu1 %v511_v18, %s1878_s23 }
 0x130   : > { %555 = vrot.lane.b32.xlu0 %v550_v20, %s1873_s21 }
 0x133   : > { %599 = vrot.lane.b32.xlu1 %v594_v25, %s1875_s22 }
 0x134   : > { %634 = vrot.lane.b32.xlu0 %v629_v27, %s1874_s13 }
 0x137   : > { %678 = vrot.lane.b32.xlu1 %v673_v29, %s1877_s25 }
 0x138   : > { %442 = vrot.lane.b32.xlu0 %v437_v31, %s1876_s16 }
 0x13b   : > { %479 = vrot.lane.b32.xlu1 %v476_v33, %s2459_s20  ;;  %s1879_s20 = smov 94  }
 0x13c   : > { %521 = vrot.lane.b32.xlu0 %v516_v34, %s1878_s23 }
 0x13f   : > { %438 = vrot.lane.b32.xlu1 %v436_v36, %s1876_s16 }
 0x140   : > { %557 = vrot.lane.b32.xlu0 %v554_v37, %s1873_s21 }
 0x143   : > { %517 = vrot.lane.b32.xlu1 %v515_v40, %s1878_s23  ;;  %v726_v40 = vld [vmem:[#allocation9] sm:$0xf] }
 0x144   : > { %636 = vrot.lane.b32.xlu0 %v633_v42, %s1874_s13 }
 0x147   : > { %595 = vrot.lane.b32.xlu1 %v593_v43, %s1875_s22 }
 0x148   : > { %715 = vrot.lane.b32.xlu0 %v712_v44, %s1879_s20 }
 0x14b   : > { %674 = vrot.lane.b32.xlu1 %v672_v45, %s1877_s25 }
 0x14c   : > { %713 = vrot.lane.b32.xlu0 %v708_v41, %s1879_s20 }
 0x14f   : > { %717 = vrot.lane.b32.xlu1 %v709_v47, %s1879_s20 }
 0x191   : > { %v482_v48 = vpop.permute.xlu0 %481 }
 0x195   : > { %v560_v49 = vpop.permute.xlu1 %559  ;;  %v478_v50 = vpop.permute.xlu0 %477 }
 0x199   : > { %v639_v51 = vpop.permute.xlu1 %638 }
 0x19a   : > { %v598_v52 = vpop.permute.xlu0 %597 }
 0x19d   : > { %v441_v53 = vpop.permute.xlu1 %440 }
 0x19e   : > { %v677_v54 = vpop.permute.xlu0 %676 }
 0x1a1   : > { %v520_v55 = vpop.permute.xlu1 %519 }
 0x1a2   : > { %v556_v56 = vpop.permute.xlu0 %555 }
 0x1a5   : > { %v600_v57 = vpop.permute.xlu1 %599 }
 0x1a6   : > { %v603_v58 = vsel %vm601_vm13, %v598_v52, %v600_v57  ;;  %v635_v59 = vpop.permute.xlu0 %634 }
 0x1a7   : > { %607 = vst [vmem:[#allocation3 + $0x28] sm:$0xf0] %v603_v58  ;;  %v1013_v58 = vld [vmem:[#allocation7 + $0x4] ss:$8 sm:$0x3] }
 0x1a9   : > { %v679_v60 = vpop.permute.xlu1 %678 }
 0x1aa   : > { %v682_v61 = vsel %vm680_vm14, %v677_v54, %v679_v60  ;;  %v443_v62 = vpop.permute.xlu0 %442 }
 0x1ab   : > { %686 = vst [vmem:[#allocation3 + $0x38] sm:$0xf0] %v682_v61  ;;  %v446_v63 = vsel %vm444_vm15, %v441_v53, %v443_v62  ;;  %v1018_v61 = vrot.slane %v1013_v58, %v2163_v3  ;;  %v1022_v62 = vrot.slane %v1013_v58, %v2165_v4 }
 0x1ac   : > { %450 = vst [vmem:[#allocation3 + $0x8] sm:$0xf0] %v446_v63 }
 0x1ad   : > { %v480_v0 = vpop.permute.xlu1 %479  ;;  %v1023_v63 = vcombine.low %v1018_v61, %v1022_v62 }
 0x1ae   : > { %v484_v1 = vsel %vm483_vm1, %v478_v50, %v480_v0  ;;  %v485_v2 = vsel %vm483_vm1, %v480_v0, %v482_v48  ;;  %v522_v5 = vpop.permute.xlu0 %521  ;;  %v1049_v0 = vld [vmem:[#allocation7 + $0x5] ss:$8 sm:$0x3] }
 0x1af   : > { %488 = vst [vmem:[#allocation3 + $0x10] sm:$0xf] %v484_v1  ;;  %489 = vst [vmem:[#allocation3 + $0x18] sm:$0xf] %v485_v2  ;;  %v525_v6 = vsel %vm2464_vm2, %v520_v55, %v522_v5  ;;  %v1054_v1 = vrot.slane %v1049_v0, %v2163_v3  ;;  %v1058_v2 = vrot.slane %v1049_v0, %v2165_v4 }
 0x1b0   : > { %529 = vst [vmem:[#allocation3 + $0x18] sm:$0xf0] %v525_v6  ;;  %v1159_v6 = vld [vmem:[#allocation7 + $0x10] ss:$8 sm:$0x3] }
 0x1b1   : > { %v439_v7 = vpop.permute.xlu1 %438  ;;  %v1059_v5 = vcombine.low %v1054_v1, %v1058_v2  ;;  %v883_v2 = vld [vmem:[#allocation7] ss:$8 sm:$0x3] }
 0x1b2   : > { %v445_v8 = vsel %vm444_vm15, %v439_v7, %v441_v53  ;;  %v558_v9 = vpop.permute.xlu0 %557  ;;  %v903_v53 = vld [vmem:[#allocation7 + $0x1] ss:$8 sm:$0x3]  ;;  %v1164_v7 = vrot.slane %v1159_v6, %v2163_v3 }
 0x1b3   : > { %449 = vst [vmem:[#allocation3] sm:$0xf0] %v445_v8  ;;  %v562_v10 = vsel %vm2462_vm3, %v556_v56, %v558_v9  ;;  %v563_v11 = vsel %vm2462_vm3, %v558_v9, %v560_v49  ;;  %v728_v17 = vld [vmem:[#allocation3 + $0x8] sm:$0xff]  ;;  %vm719_vm3 = vcmask 769024   ;;  %v908_v56 = vrot.slane %v903_v53, %v2163_v3 }
 0x1b4   : > { %566 = vst [vmem:[#allocation3 + $0x20] sm:$0xf] %v562_v10  ;;  %567 = vst [vmem:[#allocation3 + $0x28] sm:$0xf] %v563_v11  ;;  %v912_v57 = vrot.slane %v903_v53, %v2165_v4  ;;  %v1168_v8 = vrot.slane %v1159_v6, %v2165_v4 }
 0x1b5   : > { %v518_v12 = vpop.permute.xlu1 %517 }
 0x1b6   : > { %v524_v13 = vsel %vm2464_vm2, %v518_v12, %v520_v55  ;;  %v637_v14 = vpop.permute.xlu0 %636  ;;  %vm737_vm2 = vcmask 293888   ;;  %v913_v60 = vcombine.low %v908_v56, %v912_v57  ;;  %v1169_v9 = vcombine.low %v1164_v7, %v1168_v8 }
 0x1b7   : > { %528 = vst [vmem:[#allocation3 + $0x10] sm:$0xf0] %v524_v13  ;;  %v641_v15 = vsel %vm2463_vm12, %v635_v59, %v637_v14  ;;  %v642_v16 = vsel %vm2463_vm12, %v637_v14, %v639_v51  ;;  %v730_v18 = vld [vmem:[#allocation3 + $0x18] sm:$0xff]  ;;  %vm741_vm12 = vcmask 1043456  }
 0x1b8   : > { %645 = vst [vmem:[#allocation3 + $0x30] sm:$0xf] %v641_v15  ;;  %646 = vst [vmem:[#allocation3 + $0x38] sm:$0xf] %v642_v16  ;;  %v1498_v19 = vpack.c.bf16 %v730_v18, %v728_v17 }
 0x1b9   : > { %v596_v20 = vpop.permute.xlu1 %595 }
 0x1ba   : > { %v602_v21 = vsel %vm601_vm13, %v596_v20, %v598_v52  ;;  %v716_v22 = vpop.permute.xlu0 %715  ;;  %1499 = vmatprep.subr.bf16.mxu0 %v1498_v19  ;;  %v727_v26 = vld [vmem:[#allocation3] sm:$0xff] }
 0x1bb   : > { %606 = vst [vmem:[#allocation3 + $0x20] sm:$0xf0] %v602_v21  ;;  %v732_v30 = vld [vmem:[#allocation3 + $0x28] sm:$0xff] }
 0x1bc   : > { %v940_v52 = vld [vmem:[#allocation7 + $0x2] ss:$8 sm:$0x3] }
 0x1bd   : > { %v675_v23 = vpop.permute.xlu1 %674  ;;  %v949_v55 = vrot.slane %v940_v52, %v2165_v4 }
 0x1be   : > { %v681_v24 = vsel %vm680_vm14, %v675_v23, %v677_v54  ;;  %v714_v25 = vpop.permute.xlu0 %713  ;;  %v729_v27 = vld [vmem:[#allocation3 + $0x10] sm:$0xff]  ;;  %v945_v54 = vrot.slane %v940_v52, %v2163_v3  ;;  %v1086_v52 = vld [vmem:[#allocation7 + $0x6] ss:$8 sm:$0x3] }
 0x1bf   : > { %685 = vst [vmem:[#allocation3 + $0x30] sm:$0xf0] %v681_v24  ;;  %v720_v28 = vsel %vm719_vm3, %v714_v25, %v716_v22  ;;  %v1500_v29 = vpack.c.bf16 %v729_v27, %v727_v26  ;;  %v734_v31 = vld [vmem:[#allocation3 + $0x38] sm:$0xff]  ;;  %v1091_v53 = vrot.slane %v1086_v52, %v2163_v3 }
 0x1c0   : > { %724 = vst [vmem:[#allocation3 + $0x40] sm:$0xf] %v720_v28  ;;  %v1502_v32 = vpack.c.bf16 %v734_v31, %v732_v30  ;;  %v950_v59 = vcombine.low %v945_v54, %v949_v55  ;;  %v857_v31 = vld [vmem:[%s2446_s3] sm:$0xff]  ;;  %v1095_v54 = vrot.slane %v1086_v52, %v2165_v4  ;;  %v1122_v55 = vld [vmem:[#allocation7 + $0x7] ss:$8 sm:$0x3] }
 0x1c1   : > { %v718_v33 = vpop.permute.xlu1 %717  ;;  %1501 = vmatpush1.bf16.msra.mxu0 %v1500_v29  ;;  %v1127_v57 = vrot.slane %v1122_v55, %v2163_v3  ;;  %v1131_v58 = vrot.slane %v1122_v55, %v2165_v4 }
 0x1c2   : > { %v721_v34 = vsel %vm719_vm3, %v716_v22, %v718_v33  ;;  %1503 = vmatprep.subr.bf16.mxu0 %v1502_v32  ;;  %v731_v35 = vld [vmem:[#allocation3 + $0x20] sm:$0xff]  ;;  %v1096_v56 = vcombine.low %v1091_v53, %v1095_v54 }
 0x1c3   : > { %725 = vst [vmem:[#allocation3 + $0x48] sm:$0xf] %v721_v34  ;;  %v863_v32 = vld [vmem:[#allocation10] sm:$0xff] }
 0x1c6   : > { %v733_v36 = vld [vmem:[#allocation3 + $0x30] sm:$0xff] }
 0x1c7   : > { %v1504_v37 = vpack.c.bf16 %v733_v36, %v731_v35  ;;  %v735_v41 = vld [vmem:[#allocation3 + $0x40] sm:$0xf]  ;;  %v859_v35 = vcombine.high %v857_v31, %v857_v31 }
 0x1c9   : > { %1505 = vmatpush1.bf16.msra.mxu0 %v1504_v37 }
 0x1ca   : > { %v736_v38 = vld [vmem:[#allocation3 + $0x48] sm:$0xf] }
 0x1cb   : > { %1485 = vmatprep.subr.msk.mxu0 %vm741_vm12, %v736_v38 }
 0x1cd   : > { %1486 = vmatpush1.msk.msra.mxu0 %vm741_vm12, %v735_v41 }
 0x1ce   : > { %1487 = vmatmul.mubr.msk.f32.vlgmr.msra.gmra.mrb[0].mxu0 %vm737_vm2, %v726_v40  ;;  %v865_v40 = vcombine.high %v863_v32, %v863_v32 }
 0x2a1   : > { %v2273_v42 = vpop.f32.mrb[0].mxu0 }
 0x2a2   : > { %v833_v43 = vmul.f32 %v2273_v42, %v2273_v42  ;;  %v2277_v44 = vpop.f32.mrb[1].mxu0  ;;  %v819_v45 = vsel %vm741_vm12, %v2273_v42, 0.0 }
 0x2a3   : > { %v820_v46 = vsel %vm741_vm12, %v2277_v44, 0.0  ;;  %v834_v47 = vmul.f32 %v2277_v44, %v2277_v44 }
 0x2a4   : > { %v821_v48 = vadd.f32 %v820_v46, %v819_v45  ;;  %v835_v49 = vsel %vm741_vm12, %v833_v43, 0.0  ;;  %v976_v45 = vld [vmem:[#allocation7 + $0x3] ss:$8 sm:$0x3] }
 0x2a5   : > { %v836_v50 = vsel %vm741_vm12, %v834_v47, 0.0 }
 0x2a6   : > { %822 = vadd.xlane.f32.xlu1 %v821_v48  ;;  %v837_v51 = vadd.f32 %v836_v50, %v835_v49  ;;  %v981_v50 = vrot.slane %v976_v45, %v2163_v3 }
 0x2a8   : > { %838 = vadd.xlane.f32.xlu0 %v837_v51  ;;  %v985_v51 = vrot.slane %v976_v45, %v2165_v4 }
 0x2b7   : > { %951 = vrot.lane.b32.xlu1 %v950_v59, %s1866_s24  ;;  %v1132_v59 = vcombine.low %v1127_v57, %v1131_v58 }
 0x2bb   : > { %914 = vrot.lane.b32.xlu1 %v913_v60, %s1865_s9 }
 0x2bf   : > { %1024 = vrot.lane.b32.xlu1 %v1023_v63, %s1864_s12 }
 0x2c3   : > { %1060 = vrot.lane.b32.xlu1 %v1059_v5, %s1869_s26  ;;  %s2485_s26 = smov 33  }
 0x2c7   : > { %1170 = vrot.lane.b32.xlu1 %v1169_v9, %s1871_s14  ;;  %v888_v9 = vrot.slane %v883_v2, %v2163_v3  ;;  %s2494_s14 = sshll.u32 %s2142_s1, 3 }
 0x333   : > { %v823_v10 = vpop.xlane.xlu1 %822 }
 0x334   : > { %v824_v11 = vrot.slane %v823_v10, 4 }
 0x335   : > { %v839_v12 = vpop.xlane.xlu0 %838 }
 0x336   : > { %v825_v13 = vadd.f32 %v824_v11, %v823_v10  ;;  %v840_v14 = vrot.slane %v839_v12, 4  ;;  %v892_v10 = vrot.slane %v883_v2, %v2165_v4 }
 0x337   : > { %v952_v60 = vpop.permute.xlu1 %951 }
 0x338   : > { %v826_v15 = vrot.slane %v825_v13, 2  ;;  %v841_v16 = vadd.f32 %v840_v14, %v839_v12 }
 0x33a   : > { %v842_v17 = vrot.slane %v841_v16, 2  ;;  %v827_v18 = vadd.f32 %v826_v15, %v825_v13  ;;  %v953_v13 = vrot.slane %v952_v60, 4 }
 0x33b   : > { %v2317_v63 = vpop.permute.xlu1 %914 }
 0x33c   : > { %v828_v19 = vrot.slane %v827_v18, 1  ;;  %v843_v20 = vadd.f32 %v842_v17, %v841_v16  ;;  %v916_v39 = vrot.slane %v2317_v63, 4  ;;  %v954_v3 = vsel %vm468_vm6, %v953_v13, %v952_v60 }
 0x33d   : > { %vm2490_vm6 = vcmask 908288  }
 0x33e   : > { %v829_v21 = vadd.f32 %v828_v19, %v827_v18  ;;  %v844_v22 = vrot.slane %v843_v20, 1  ;;  %v893_v18 = vcombine.low %v888_v9, %v892_v10  ;;  %v917_v4 = vsel %vm428_vm9, %v916_v39, %v2317_v63 }
 0x33f   : > { %v1025_v5 = vpop.permute.xlu1 %1024 }
 0x340   : > { %1514 = vpush %v829_v21  ;;  %v845_v23 = vadd.f32 %v844_v22, %v843_v20  ;;  %v1026_v7 = vrot.slane %v1025_v5, 4 }
 0x342   : > { %1516 = vpush %v845_v23 }
 0x343   : > { %v1061_v16 = vpop.permute.xlu1 %1060 }
 0x344   : > { %v1062_v20 = vrot.slane %v1061_v16, 4 }
 0x347   : > { %v1171_v53 = vpop.permute.xlu1 %1170 }
 0x348   : > { %v1172_v55 = vrot.slane %v1171_v53, 4 }
 0x371   : > { %s1515_s9 = spop %1514 }
 0x372   : > { %v831_v24 = vstv %s1515_s9  ;;  %s2483_s9 = smov 16  }
 0x373   : > { %v832_v25 = vmul.f32 0.0009765625, %v831_v24  ;;  %s1517_s24 = spop %1516 }
 0x374   : > { %v847_v26 = vstv %s1517_s24  ;;  %s2484_s24 = smov 32  }
 0x375   : > { %v848_v27 = vmul.f32 0.0009765625, %v847_v26  ;;  %v849_v28 = vmul.f32 %v832_v25, %v832_v25  ;;  %v851_v33 = vsub.f32 %v2273_v42, %v832_v25  ;;  %v852_v34 = vsub.f32 %v2277_v44, %v832_v25 }
 0x376   : > { %v986_v44 = vcombine.low %v981_v50, %v985_v51  ;;  %v1063_v26 = vsel %vm585_vm7, %v1062_v20, %v1061_v16  ;;  %vm2491_vm7 = vmmov %vm2490_vm6 }
 0x377   : > { %v850_v29 = vsub.f32 %v848_v27, %v849_v28 }
 0x379   : > { %v853_v30 = vadd.f32 1e-05, %v850_v29 }
 0x37b   : > { %1633 = vrsqrt.f32 %v853_v30 }
 0x385   : > { %v1634_v36 = vpop.eup %1633 }
 0x386   : > { %v855_v37 = vmul.f32 %v1634_v36, %v851_v33  ;;  %v856_v38 = vmul.f32 %v1634_v36, %v852_v34 }
 0x388   : > { %v861_v41 = vmul.f32 %v857_v31, %v855_v37  ;;  %v862_v43 = vmul.f32 %v859_v35, %v856_v38 }
 0x38a   : > { %v867_v46 = vadd.f32 %v863_v32, %v861_v41  ;;  %v868_v47 = vadd.f32 %v865_v40, %v862_v43  ;;  %v1027_v41 = vsel %vm383_vm4, %v1026_v7, %v1025_v5 }
 0x38c   : > { %v869_v48 = vmax.f32 %v867_v46, 0.0  ;;  %v870_v49 = vmax.f32 %v868_v47, 0.0 }
 0x38e   : > { %v873_v42 = vcombine.low %v869_v48, %v870_v49 }
 0x390   : > { %874 = vrot.lane.b32.xlu0 %v873_v42, %s1864_s12  ;;  %s2486_s12 = smov 126  }
 0x394   : > { %987 = vrot.lane.b32.xlu0 %v986_v44, %s2483_s9  ;;  %s373_s9 = scalar_lea.vmem [#allocation13], %s2494_s14 }
 0x398   : > { %1097 = vrot.lane.b32.xlu0 %v1096_v56, %s2484_s24  ;;  %s1360_s24 = sshll.u32 %s373_s9, 4  ;;  %s2401_s24 = int_to_ptr.vmem [resolvable:$true] %s1360_s24 }
 0x39c   : > { %1133 = vrot.lane.b32.xlu0 %v1132_v59, %s2485_s26 }
 0x402   : > { %v875_v61 = vpop.permute.xlu0 %874 }
 0x403   : > { %v876_v62 = vrot.slane %v875_v61, 4 }
 0x405   : > { %v877_v0 = vsel %vm383_vm4, %v876_v62, %v875_v61  ;;  %881 = vst.msk [vmem:[#allocation2 + $0x8] sm:$0xf] %vm374_vm0, %v876_v62  ;;  %vm2487_vm0 = vcmask 277504   ;;  %vm2488_vm4 = vcmask 916480  }
 0x406   : > { %880 = vst.msk [vmem:[#allocation2] sm:$0xff] %vm2193_vm5, %v877_v0  ;;  %v2323_v1 = vpop.permute.xlu0 %987  ;;  %v1173_v58 = vsel %vm2487_vm0, %v1172_v55, %v1171_v53  ;;  %vm2489_vm5 = vmmov %vm2488_vm4 }
 0x407   : > { %v989_v23 = vrot.slane %v2323_v1, 4 }
 0x409   : > { %v990_v31 = vsel %vm507_vm10, %v989_v23, %v2323_v1 }
 0x40a   : > { %v1098_v6 = vpop.permute.xlu0 %1097 }
 0x40b   : > { %v1099_v12 = vrot.slane %v1098_v6, 4 }
 0x40c   : > { %v1012_v8 = vld [vmem:[#allocation2 + $0x8] sm:$0xf] }
 0x40d   : > { %v1031_v11 = vmul.f32 %v1026_v7, %v1012_v8  ;;  %v1085_v14 = vld [vmem:[#allocation2 + $0x8] sm:$0xf]  ;;  %v1011_v19 = vld [vmem:[#allocation2] sm:$0xff]  ;;  %v1100_v45 = vsel %vm625_vm11, %v1099_v12, %v1098_v6 }
 0x40e   : > { %v939_v15 = vld [vmem:[#allocation2 + $0x8] sm:$0xf]  ;;  %v1104_v21 = vmul.f32 %v1099_v12, %v1085_v14  ;;  %v1134_v22 = vpop.permute.xlu0 %1133  ;;  %v957_v24 = vmul.f32 %v1011_v19, %v954_v3  ;;  %v895_v25 = vmul.f32 %v1011_v19, %v893_v18  ;;  %v920_v28 = vmul.f32 %v1011_v19, %v917_v4 }
 0x40f   : > { %1039 = vrot.lane.b32.xlu0 %v1031_v11, %s1873_s21  ;;  %v958_v17 = vmul.f32 %v953_v13, %v939_v15  ;;  %v1135_v27 = vrot.slane %v1134_v22, 4  ;;  %v1048_v29 = vld [vmem:[#allocation2 + $0x8] sm:$0xf]  ;;  %v1066_v32 = vmul.f32 %v1063_v26, %v1011_v19  ;;  %v993_v33 = vmul.f32 %v1011_v19, %v990_v31 }
 0x410   : > { %v897_v30 = vcombine.high %v895_v25, %v895_v25  ;;  %899 = vst [vmem:[#allocation3] sm:$0xf] %v895_v25  ;;  %v1067_v34 = vmul.f32 %v1062_v20, %v1048_v29  ;;  %v1121_v36 = vld [vmem:[#allocation2 + $0x8] sm:$0xf]  ;;  %v1030_v43 = vmul.f32 %v1027_v41, %v1011_v19  ;;  %v1103_v48 = vmul.f32 %v1100_v45, %v1011_v19 }
 0x411   : > { %966 = vrot.lane.b32.xlu1 %v958_v17, %s2486_s12  ;;  %v1136_v35 = vsel %vm664_vm8, %v1135_v27, %v1134_v22  ;;  %v1140_v38 = vmul.f32 %v1135_v27, %v1121_v36  ;;  %v902_v47 = vld [vmem:[#allocation2 + $0x8] sm:$0xf]  ;;  %v961_v51 = vcombine.high %v957_v24, %v957_v24  ;;  %v924_v44 = vcombine.low %v920_v28, %v920_v28 }
 0x412   : > { %900 = vst [vmem:[#allocation3 + $0x8] sm:$0xf] %v897_v30  ;;  %v1139_v37 = vmul.f32 %v1136_v35, %v1011_v19  ;;  %v1071_v40 = vcombine.low %v1067_v34, %v1067_v34  ;;  %v921_v49 = vmul.f32 %v916_v39, %v902_v47  ;;  %v975_v50 = vld [vmem:[#allocation2 + $0x8] sm:$0xf]  ;;  %v997_v56 = vcombine.low %v993_v33, %v993_v33 }
 0x413   : > { %1112 = vrot.lane.b32.xlu0 %v1104_v21, %s1874_s13  ;;  %v1144_v46 = vcombine.low %v1140_v38, %v1140_v38  ;;  %v994_v52 = vmul.f32 %v989_v23, %v975_v50  ;;  %v1034_v57 = vcombine.high %v1030_v43, %v1030_v43  ;;  %v1070_v59 = vcombine.low %v1066_v32, %v1066_v32  ;;  %v1158_v63 = vld [vmem:[#allocation2 + $0x8] sm:$0xf] }
 0x414   : > { %v925_v42 = vcombine.low %v921_v49, %v921_v49  ;;  %v1176_v60 = vmul.f32 %v1173_v58, %v1011_v19  ;;  %v1107_v61 = vcombine.high %v1103_v48, %v1103_v48  ;;  %v1143_v62 = vcombine.low %v1139_v37, %v1139_v37 }
 0x415   : > { %962 = vrot.lane.b32.xlu1 %v957_v24, %s2486_s12  ;;  %v998_v54 = vcombine.low %v994_v52, %v994_v52  ;;  %v1177_v1 = vmul.f32 %v1172_v55, %v1158_v63  ;;  %vm2492_vm8 = vcmask 785408   ;;  %v1193_v55 = vld [vmem:[#allocation12] sm:$0xf] }
 0x416   : > { %v1180_v0 = vcombine.high %v1176_v60, %v1176_v60  ;;  %vm2493_vm9 = vmmov %vm2492_vm8 }
 0x417   : > { %928 = vrot.lane.b32.xlu0 %v920_v28, %s1876_s16 }
 0x419   : > { %1074 = vrot.lane.b32.xlu1 %v1066_v32, %s1875_s22 }
 0x41b   : > { %1001 = vrot.lane.b32.xlu0 %v993_v33, %s1878_s23 }
 0x41d   : > { %1147 = vrot.lane.b32.xlu1 %v1139_v37, %s1877_s25 }
 0x41f   : > { %1076 = vrot.lane.b32.xlu0 %v1071_v40, %s1875_s22 }
 0x421   : > { %1035 = vrot.lane.b32.xlu1 %v1030_v43, %s1873_s21 }
 0x423   : > { %1149 = vrot.lane.b32.xlu0 %v1144_v46, %s1877_s25 }
 0x425   : > { %1108 = vrot.lane.b32.xlu1 %v1103_v48, %s1874_s13 }
 0x427   : > { %964 = vrot.lane.b32.xlu0 %v961_v51, %s2486_s12 }
 0x429   : > { %930 = vrot.lane.b32.xlu1 %v925_v42, %s1876_s16 }
 0x42b   : > { %926 = vrot.lane.b32.xlu0 %v924_v44, %s1876_s16 }
 0x42d   : > { %1003 = vrot.lane.b32.xlu1 %v998_v54, %s1878_s23 }
 0x42f   : > { %999 = vrot.lane.b32.xlu0 %v997_v56, %s1878_s23 }
 0x431   : > { %1037 = vrot.lane.b32.xlu1 %v1034_v57, %s1873_s21 }
 0x433   : > { %1072 = vrot.lane.b32.xlu0 %v1070_v59, %s1875_s22 }
 0x435   : > { %1110 = vrot.lane.b32.xlu1 %v1107_v61, %s1874_s13  ;;  %s1497_s13 = sshll.u32 %s1947_s11, 7  ;;  %s1880_s11 = smov [#allocation13]  }
 0x437   : > { %1145 = vrot.lane.b32.xlu0 %v1143_v62, %s1877_s25  ;;  %s1784_s25 = sshll.u32 %s1880_s11, 4  ;;  %s1785_s25 = int_to_ptr.vmem [resolvable:$false] %s1784_s25 }
 0x438   : > { %s1786_s16 = scalar_lea.vmem %s1785_s25, 256  ;;  %p1787_p12 = scmp.lt.s32.totalorder %s2401_s24, %s1785_s25 }
 0x439   : > { %1183 = vrot.lane.b32.xlu1 %v1180_v0, %s1879_s20 }
 0x43b   : > { %1185 = vrot.lane.b32.xlu0 %v1177_v1, %s1879_s20 }
 0x43d   : > { %1181 = vrot.lane.b32.xlu1 %v1176_v60, %s1879_s20 }
 0x481   : > { %v1040_v2 = vpop.permute.xlu0 %1039 }
 0x483   : > { %v967_v5 = vpop.permute.xlu1 %966 }
 0x485   : > { %v1113_v6 = vpop.permute.xlu0 %1112 }
 0x487   : > { %v963_v7 = vpop.permute.xlu1 %962 }
 0x489   : > { %v929_v8 = vpop.permute.xlu0 %928 }
 0x48b   : > { %v1075_v9 = vpop.permute.xlu1 %1074 }
 0x48d   : > { %v1002_v10 = vpop.permute.xlu0 %1001 }
 0x48f   : > { %v1148_v11 = vpop.permute.xlu1 %1147 }
 0x491   : > { %v1077_v12 = vpop.permute.xlu0 %1076 }
 0x492   : > { %v1079_v13 = vsel %vm601_vm13, %v1075_v9, %v1077_v12 }
 0x493   : > { %1083 = vst [vmem:[#allocation3 + $0x28] sm:$0xf0] %v1079_v13  ;;  %v1036_v14 = vpop.permute.xlu1 %1035 }
 0x495   : > { %v1150_v15 = vpop.permute.xlu0 %1149 }
 0x496   : > { %v1152_v39 = vsel %vm680_vm14, %v1148_v11, %v1150_v15 }
 0x497   : > { %1156 = vst [vmem:[#allocation3 + $0x38] sm:$0xf0] %v1152_v39  ;;  %v1109_v16 = vpop.permute.xlu1 %1108 }
 0x499   : > { %v965_v17 = vpop.permute.xlu0 %964 }
 0x49a   : > { %v968_v18 = vsel %vm483_vm1, %v963_v7, %v965_v17  ;;  %v969_v19 = vsel %vm483_vm1, %v965_v17, %v967_v5 }
 0x49b   : > { %972 = vst [vmem:[#allocation3 + $0x10] sm:$0xf] %v968_v18  ;;  %973 = vst [vmem:[#allocation3 + $0x18] sm:$0xf] %v969_v19  ;;  %v931_v20 = vpop.permute.xlu1 %930 }
 0x49c   : > { %v933_v21 = vsel %vm444_vm15, %v929_v8, %v931_v20 }
 0x49d   : > { %v927_v22 = vpop.permute.xlu0 %926  ;;  %937 = vst [vmem:[#allocation3 + $0x8] sm:$0xf0] %v933_v21 }
 0x49e   : > { %v932_v3 = vsel %vm444_vm15, %v927_v22, %v929_v8 }
 0x49f   : > { %936 = vst [vmem:[#allocation3] sm:$0xf0] %v932_v3  ;;  %v1004_v4 = vpop.permute.xlu1 %1003 }
 0x4a0   : > { %v1006_v23 = vsel %vm2488_vm4, %v1002_v10, %v1004_v4 }
 0x4a1   : > { %v1000_v24 = vpop.permute.xlu0 %999  ;;  %1010 = vst [vmem:[#allocation3 + $0x18] sm:$0xf0] %v1006_v23  ;;  %v1322_v23 = vld [vmem:[%s2449_s6] sm:$0xff] }
 0x4a2   : > { %v1005_v25 = vsel %vm2489_vm5, %v1000_v24, %v1002_v10  ;;  %v1328_v24 = vld [vmem:[%s2450_s7] sm:$0xff] }
 0x4a3   : > { %1009 = vst [vmem:[#allocation3 + $0x10] sm:$0xf0] %v1005_v25  ;;  %v1038_v26 = vpop.permute.xlu1 %1037 }
 0x4a4   : > { %v1041_v27 = vsel %vm2490_vm6, %v1036_v14, %v1038_v26  ;;  %v1042_v28 = vsel %vm2491_vm7, %v1038_v26, %v1040_v2  ;;  %v1195_v35 = vld [vmem:[#allocation3 + $0x8] sm:$0xff] }
 0x4a5   : > { %v1073_v29 = vpop.permute.xlu0 %1072  ;;  %1045 = vst [vmem:[#allocation3 + $0x20] sm:$0xf] %v1041_v27  ;;  %1046 = vst [vmem:[#allocation3 + $0x28] sm:$0xf] %v1042_v28  ;;  %v1324_v27 = vcombine.high %v1322_v23, %v1322_v23 }
 0x4a6   : > { %v1078_v30 = vsel %vm601_vm13, %v1073_v29, %v1075_v9  ;;  %v1194_v40 = vld [vmem:[#allocation3] sm:$0xff] }
 0x4a7   : > { %1082 = vst [vmem:[#allocation3 + $0x20] sm:$0xf0] %v1078_v30  ;;  %v1111_v31 = vpop.permute.xlu1 %1110 }
 0x4a8   : > { %v1114_v32 = vsel %vm2492_vm8, %v1109_v16, %v1111_v31  ;;  %v1115_v33 = vsel %vm2493_vm9, %v1111_v31, %v1113_v6  ;;  %v1197_v36 = vld [vmem:[#allocation3 + $0x18] sm:$0xff]  ;;  %v1330_v31 = vcombine.high %v1328_v24, %v1328_v24 }
 0x4a9   : > { %v1146_v34 = vpop.permute.xlu0 %1145  ;;  %1118 = vst [vmem:[#allocation3 + $0x30] sm:$0xf] %v1114_v32  ;;  %1119 = vst [vmem:[#allocation3 + $0x38] sm:$0xf] %v1115_v33  ;;  %v1506_v38 = vpack.c.bf16 %v1197_v36, %v1195_v35  ;;  %v1637_v32 = vld [vmem:[%s2148_s17] sm:$0xff]  ;;  %s2399_s17 = scalar_lea.hbm %s2451_s8, %s1497_s13 }
 0x4aa   : > { %v1151_v37 = vsel %vm680_vm14, %v1146_v34, %v1148_v11  ;;  %v1196_v41 = vld [vmem:[#allocation3 + $0x10] sm:$0xff]  ;;  %v1334_v33 = vcombine.high %v1637_v32, %v1637_v32 }
 0x4ab   : > { %1155 = vst [vmem:[#allocation3 + $0x30] sm:$0xf0] %v1151_v37  ;;  %v1508_v43 = vpack.c.bf16 %v1196_v41, %v1194_v40  ;;  %1507 = vmatprep.subr.bf16.mxu1 %v1506_v38  ;;  %v1184_v45 = vpop.permute.xlu1 %1183 }
 0x4ac   : > { %v1199_v50 = vld [vmem:[#allocation3 + $0x28] sm:$0xff] }
 0x4ad   : > { %v1186_v46 = vpop.permute.xlu0 %1185  ;;  %1509 = vmatpush1.bf16.msra.mxu1 %v1508_v43 }
 0x4ae   : > { %v1188_v47 = vsel %vm719_vm3, %v1184_v45, %v1186_v46  ;;  %v1198_v42 = vld [vmem:[#allocation3 + $0x20] sm:$0xff] }
 0x4af   : > { %1192 = vst [vmem:[#allocation3 + $0x48] sm:$0xf] %v1188_v47  ;;  %v1182_v48 = vpop.permute.xlu1 %1181 }
 0x4b0   : > { %v1187_v49 = vsel %vm719_vm3, %v1182_v48, %v1184_v45  ;;  %v1201_v51 = vld [vmem:[#allocation3 + $0x38] sm:$0xff] }
 0x4b1   : > { %1191 = vst [vmem:[#allocation3 + $0x40] sm:$0xf] %v1187_v49  ;;  %v1510_v52 = vpack.c.bf16 %v1201_v51, %v1199_v50 }
 0x4b2   : > { %v1200_v44 = vld [vmem:[#allocation3 + $0x30] sm:$0xff] }
 0x4b3   : > { %v1512_v53 = vpack.c.bf16 %v1200_v44, %v1198_v42  ;;  %1511 = vmatprep.subr.bf16.mxu1 %v1510_v52 }
 0x4b5   : > { %1513 = vmatpush1.bf16.msra.mxu1 %v1512_v53 }
 0x4b6   : > { %v1203_v54 = vld [vmem:[#allocation3 + $0x48] sm:$0xf] }
 0x4b7   : > { %1488 = vmatprep.subr.msk.mxu1 %vm741_vm12, %v1203_v54 }
 0x4b8   : > { %v1202_v56 = vld [vmem:[#allocation3 + $0x40] sm:$0xf] }
 0x4b9   : > { %1489 = vmatpush1.msk.msra.mxu1 %vm741_vm12, %v1202_v56 }
 0x4ba   : > { %1490 = vmatmul.mubr.msk.f32.vlgmr.msra.gmra.mrb[0].mxu1 %vm737_vm2, %v1193_v55 }
 0x58d   : > { %v1279_v57 = vpop.f32.mrb[0].mxu1 }
 0x58e   : > { %v1298_v58 = vmul.f32 %v1279_v57, %v1279_v57  ;;  %v1281_v59 = vpop.f32.mrb[1].mxu1  ;;  %v1284_v60 = vsel %vm741_vm12, %v1279_v57, 0.0 }
 0x58f   : > { %v1285_v61 = vsel %vm741_vm12, %v1281_v59, 0.0  ;;  %v1299_v62 = vmul.f32 %v1281_v59, %v1281_v59 }
 0x590   : > { %v1286_v63 = vadd.f32 %v1285_v61, %v1284_v60  ;;  %v1300_v0 = vsel %vm741_vm12, %v1298_v58, 0.0 }
 0x591   : > { %v1301_v1 = vsel %vm741_vm12, %v1299_v62, 0.0 }
 0x592   : > { %1287 = vadd.xlane.f32.xlu0 %v1286_v63  ;;  %v1302_v2 = vadd.f32 %v1301_v1, %v1300_v0 }
 0x594   : > { %1303 = vadd.xlane.f32.xlu1 %v1302_v2 }
 0x61f   : > { %v1288_v5 = vpop.xlane.xlu0 %1287 }
 0x620   : > { %v1289_v6 = vrot.slane %v1288_v5, 4 }
 0x621   : > { %v1304_v7 = vpop.xlane.xlu1 %1303 }
 0x622   : > { %v1290_v8 = vadd.f32 %v1289_v6, %v1288_v5  ;;  %v1305_v9 = vrot.slane %v1304_v7, 4 }
 0x624   : > { %v1291_v10 = vrot.slane %v1290_v8, 2  ;;  %v1306_v11 = vadd.f32 %v1305_v9, %v1304_v7 }
 0x626   : > { %v1292_v12 = vadd.f32 %v1291_v10, %v1290_v8  ;;  %v1307_v13 = vrot.slane %v1306_v11, 2 }
 0x628   : > { %v1308_v14 = vadd.f32 %v1307_v13, %v1306_v11  ;;  %v1293_v15 = vrot.slane %v1292_v12, 1 }
 0x62a   : > { %v1294_v39 = vadd.f32 %v1293_v15, %v1292_v12  ;;  %v1309_v16 = vrot.slane %v1308_v14, 1 }
 0x62c   : > { %1518 = vpush %v1294_v39  ;;  %v1310_v17 = vadd.f32 %v1309_v16, %v1308_v14 }
 0x62e   : > { %1520 = vpush %v1310_v17 }
 0x65d   : > { %s1519_s22 = spop %1518 }
 0x65e   : > { %v1296_v18 = vstv %s1519_s22  ;;  %s1346_s22 = scalar_lea.sflag [#allocation6], %s2142_s1 }
 0x65f   : > { %v1297_v19 = vmul.f32 0.0009765625, %v1296_v18  ;;  %s1521_s23 = spop %1520 }
 0x660   : > { %v1312_v20 = vstv %s1521_s23  ;;  %s1780_s23 = scalar_lea.vmem %s2401_s24, 128 }
 0x661   : > { %v1313_v21 = vmul.f32 0.0009765625, %v1312_v20  ;;  %v1314_v22 = vmul.f32 %v1297_v19, %v1297_v19  ;;  %v1316_v25 = vsub.f32 %v1279_v57, %v1297_v19  ;;  %v1317_v26 = vsub.f32 %v1281_v59, %v1297_v19  ;;  %p1781_p6 = scmp.ne.s32.totalorder %s2401_s24, %s1780_s23  ;;  %p1788_p3 = scmp.lt.s32.totalorder %s1786_s16, %s1780_s23 }
 0x663   : > { %v1315_v3 = vsub.f32 %v1313_v21, %v1314_v22  ;;  %p1782_p7 = pnand %p1781_p6, %p2495_p5  ;;  %p1789_p13 = por %p1788_p3, %p1787_p12 }
 0x665   : > { %v1318_v4 = vadd.f32 1e-05, %v1315_v3  ;;  %p1783_p9 = pneg %p1782_p7 }
 0x667   : > { %1635 = vrsqrt.f32 %v1318_v4  ;;  %p1790_p0 = pnand %p1789_p13, %p1783_p9 }
 0x671   : > { %v1636_v28 = vpop.eup %1635 }
 0x672   : > { %v1320_v29 = vmul.f32 %v1636_v28, %v1316_v25  ;;  %v1321_v30 = vmul.f32 %v1636_v28, %v1317_v26 }
 0x674   : > { %v1326_v34 = vmul.f32 %v1322_v23, %v1320_v29  ;;  %v1327_v35 = vmul.f32 %v1324_v27, %v1321_v30 }
 0x676   : > { %v1332_v36 = vadd.f32 %v1328_v24, %v1326_v34  ;;  %v1333_v37 = vadd.f32 %v1330_v31, %v1327_v35 }
 0x678   : > { %v1336_v38 = vadd.f32 %v1637_v32, %v1332_v36  ;;  %v1337_v40 = vadd.f32 %v1334_v33, %v1333_v37 }
 0x67a   : > { %v1338_v41 = vmax.f32 %v1336_v38, 0.0  ;;  %v1339_v43 = vmax.f32 %v1337_v40, 0.0 }
 0x67c   : > { %v1342_v45 = vcombine.low %v1338_v41, %v1339_v43 }
 0x67e   : > { %1344 = vst [vmem:[%s373_s9] sm:$0xff] %v1342_v45 }
 0x67f   : > { %1793 = shalt.err (!%p1790_p0)
}
 0x680   : > { %s1794_s1 = scalar_lea.hbm %s2399_s17, 128  ;;  %s1798_s13 = scalar_lea.hbm %s2451_s8, 256 }
 0x681   : > { %p1795_p2 = scmp.ne.s32.totalorder %s2399_s17, %s1794_s1  ;;  %p1799_p10 = scmp.lt.u32.totalorder %s2399_s17, %s2451_s8 }
 0x682   : > { %p1800_p11 = scmp.lt.u32.totalorder %s1798_s13, %s1794_s1  ;;  %p1802_p6 = scmp.lt.u32.totalorder %s1794_s1, %s2399_s17 }
 0x683   : > { %p1796_p8 = pnand %p1795_p2, %p2495_p5 }
 0x684   : > { %p1801_p1 = por %p1800_p11, %p1799_p10 }
 0x685   : > { %p1797_p4 = pneg %p1796_p8 }
 0x686   : > { %p1803_p7 = por %p1802_p6, %p1801_p1 }
 0x688   : > { %p1804_p9 = pnand %p1803_p7, %p1797_p4 }
 0x68a   : > { %1807 = shalt.err (!%p1804_p9)
}
 0x68b   : > { %1540 = dma.vmem_to_hbm [thread:$0]  (%p2495_p5), %s2401_s24, 128, %s2399_s17, %s1346_s22  }
 0x68c PF: > { %s1372_s26 = sand.u32 1, %s1842_s27   ;;  %p2496_p12 = scmp.ne.s32.totalorder %s2474_s19, 0 }
 0x68d   : > { %p2497_p3 = scmp.ge.s32.totalorder %s1854_s30, 2  ;;  %s1373_s12 = scalar_lea.sflag [#allocation6], %s1372_s26 }
 0x68f   : > { %p1560_p13 = pnand %p2497_p3, %p2496_p12 }
 0x691   : > { %1837 = dma.done.wait (!%p1560_p13), %s1373_s12, 128  }
 0x692   : > { %1839 = vsyncadd (!%p1560_p13), %s1373_s12, 4294967168  ;;  %p23_p0 = scmp.ge.s32.totalorder %s2066_s15, 4   ;;  %s2498_s27 = smov %s1846_s28 }
 0x693   : > { %s2499_s28 = smov %s1850_s29  ;;  %s2500_s29 = smov %s2077_s10 }
 0x694   : > { %s2501_s30 = smov %s2066_s15  ;;  %25 = sbr.rel (!%p23_p0) target bundleno = 9 (0x9), region = 121 }
 0x69b   :  { %1378 = vsyncpa [#allocation5], 1 }
 0x69c   :  { %1380 = vsyncpa [#allocation5 + $0x1], 1 }
 0x69d   :  { %1381 = vsyncpa [#allocation8], 1 }
 0x69e   :  { %1382 = vsyncpa [#allocation11], 1 }
 0x69f   :  { %1383 = vsyncpa [#allocation6], 1 }
 0x6a0   :  { %1385 = vsyncpa [#allocation6 + $0x1], 1 }

</bundles_post_ra>
